<compile_context>
chip_gen: v7x
topology: tpu7x:2x2x1
jax: 0.10.0
libtpu: 0.0.40
codegen_flags: <defaults>
</compile_context>

<pallas_src>
import functools
import math

import jax
import jax.numpy as jnp
from jax import lax
from jax.experimental import pallas as pl
from jax.experimental.pallas import tpu as pltpu


_LAYER_KEYS = ("wqkvT", "bqkv", "wo", "bo", "g1", "be1",
               "w1", "b1", "w2T", "b2", "g2", "be2")


# -----------------------------------------------------------------------------
# The fused kernel.  grid = (branch, layer); branch axis is "parallel" (2 TCs on
# v7x), layer axis is "arbitrary" (activation carry in VMEM scratch).
# -----------------------------------------------------------------------------
def _branch_layer_kernel(
    inv_d_ref, ascale_ref, x_in_ref, pe_ref, gid_row_ref, gid_col_ref, dmask_ref,
    ce_w1_ref, ce_b1_ref, ce_w2_ref, ce_b2_ref,
    wqkvT_ref, bqkv_ref, wo_ref, bo_ref, g1_ref, be1_ref,
    w1_ref, b1_ref, w2T_ref, b2_ref, g2_ref, be2_ref,
    pool_w_ref, pool_b_ref,
    out_ref, act_ref,
    *, n_heads, num_layers, batch):

    b_idx = pl.program_id(0)     # branch: 0 = chart, 1 = news
    l_idx = pl.program_id(1)     # encoder layer

    dp = act_ref.shape[1]        # padded model width (common to both branches)

    # ---------------- branch init on the first layer step ----------------
    @pl.when(jnp.logical_and(l_idx == 0, b_idx == 0))
    def _init_chart():
        raw = x_in_ref[...]                                              # [N, Cin]
        h = jnp.maximum(
            jnp.dot(raw, ce_w1_ref[...], preferred_element_type=jnp.float32)
            + ce_b1_ref[...], 0.0)
        emb = jnp.dot(h, ce_w2_ref[...], preferred_element_type=jnp.float32) + ce_b2_ref[...]
        act_ref[...] = emb + pe_ref[...]                                 # pe[:B] quirk slab

    @pl.when(jnp.logical_and(l_idx == 0, b_idx != 0))
    def _init_news():
        act_ref[...] = x_in_ref[:, :dp] + pe_ref[...]

    # ---------------- one post-norm nn.TransformerEncoderLayer ----------------
    inv_d = inv_d_ref[...]       # (1,1) 1/d_true   (LayerNorm divisor on the padded width)
    dmask = dmask_ref[...]       # (1,dp) 1.0 on real lanes, 0.0 on padded lanes

    def layer_norm(v, g, beta):
        mu = jnp.sum(v, axis=-1, keepdims=True) * inv_d
        diff = (v - mu) * dmask
        var = jnp.sum(diff * diff, axis=-1, keepdims=True) * inv_d
        return diff * lax.rsqrt(var + 1e-5) * g + beta

    x = act_ref[...]                                                     # [N, dp] f32
    npad = x.shape[0]
    dhp = dp // n_heads

    # Block-diagonal additive mask generated in-kernel (no O(N^2) HBM traffic).
    gid_r = gid_row_ref[...]                                             # [1, N] int32
    gid_c = gid_col_ref[...]                                             # [N, 1] int32
    attn_mask = jnp.where(gid_c == gid_r, 0.0, -1e30).astype(jnp.float32)  # [N, N]

    # Fused QKV on the transposed slab: qkvT[f, i] = sum_d wqkvT[f, d] * x[i, d].
    wqkvT = wqkvT_ref[...]                                               # [3dp, dp] bf16
    qkvT = lax.dot_general(wqkvT, x.astype(wqkvT.dtype),
                           (((1,), (1,)), ((), ())),
                           preferred_element_type=jnp.float32) + bqkv_ref[...]   # [3dp, N]
    qkvT = qkvT.reshape(3, n_heads, dhp, npad)            # layout-free (dhp = sublane group)
    q_t = qkvT[0] * ascale_ref[...]                       # scale in f32, not folded into bf16 W
    k_t = qkvT[1]
    v_t = qkvT[2]

    # Batched scores / context via dot_general (no per-head loop, no explicit .T):
    #   s[h, i, j]    = sum_d q_t[h, d, i] * k_t[h, d, j]
    s = lax.dot_general(q_t, k_t, (((1,), (1,)), ((0,), (0,))),
                        preferred_element_type=jnp.float32)               # [nh, N, N]
    s = s + attn_mask
    s = s - jnp.max(s, axis=-1, keepdims=True)
    p = jnp.exp(s)
    p = p / jnp.sum(p, axis=-1, keepdims=True)            # exact division in attention softmax
    #   ctx_t[h, d, i] = sum_j v_t[h, d, j] * p[h, i, j]
    ctx_t = lax.dot_general(v_t, p, (((2,), (2,)), ((0,), (0,))),
                            preferred_element_type=jnp.float32)           # [nh, dhp, N]
    ctx_t = ctx_t.reshape(dp, npad)                       # layout-free head re-pack

    wo = wo_ref[...]                                                      # [dp, dp] bf16
    attn = lax.dot_general(ctx_t.astype(wo.dtype), wo, (((0,), (0,)), ((), ())),
                           preferred_element_type=jnp.float32) + bo_ref[...]     # [N, dp]

    x = layer_norm(x + attn, g1_ref[...], be1_ref[...])

    # FFN (relu); hidden produced in bf16 to halve the [N, ff] live slab feeding w2.
    w1 = w1_ref[...]                                                      # [dp, ff] bf16
    h = jnp.maximum(
        jnp.dot(x.astype(w1.dtype), w1, preferred_element_type=jnp.float32) + b1_ref[...],
        0.0).astype(jnp.bfloat16)
    w2T = w2T_ref[...]                                                    # [dp, ff] bf16
    ffo = lax.dot_general(h, w2T, (((1,), (1,)), ((), ())),
                          preferred_element_type=jnp.float32) + b2_ref[...]      # [N, dp]

    x = layer_norm(x + ffo, g2_ref[...], be2_ref[...])
    act_ref[...] = x

    # ---------------- finalize: vectorized attentive pooling on the last layer ----------------
    @pl.when(l_idx == num_layers - 1)
    def _finalize():
        pool_w = pool_w_ref[...]                                          # [1, dp]
        sc = lax.dot_general(pool_w, x, (((1,), (1,)), ((), ())),
                             preferred_element_type=jnp.float32) + pool_b_ref[...]   # [1, N]
        bidx = lax.broadcasted_iota(jnp.int32, (batch, npad), 0)
        sel = gid_r == bidx                                               # [B, N]
        s2 = jnp.where(sel, sc, -1e30)
        s2 = s2 - jnp.max(s2, axis=-1, keepdims=True)
        pw = jnp.exp(s2)
        att = pw * pl.reciprocal(jnp.sum(pw, axis=-1, keepdims=True), approx=True)
        out_ref[...] = jnp.dot(att, x, preferred_element_type=jnp.float32)        # [B, dp]


# -----------------------------------------------------------------------------
# Host-side packing of weights into the branch/layer-stacked, head-padded layout.
# -----------------------------------------------------------------------------
def _pad_to(a, shape):
    return jnp.pad(a, [(0, t - s) for s, t in zip(a.shape, shape)])


def _pad_head_cols(w, n_heads, dp):
    # w: [d, n_heads*dh] (output columns grouped per head) -> [dp, n_heads*dhp]
    d = w.shape[0]
    dh = w.shape[1] // n_heads
    dhp = dp // n_heads
    w = w.reshape(d, n_heads, dh)
    w = jnp.pad(w, ((0, dp - d), (0, 0), (0, dhp - dh)))
    return w.reshape(dp, n_heads * dhp)


def _pad_head_vec(v, n_heads, dp):
    dh = v.shape[0] // n_heads
    dhp = dp // n_heads
    v = v.reshape(n_heads, dh)
    v = jnp.pad(v, ((0, 0), (0, dhp - dh)))
    return v.reshape(n_heads * dhp)


def _pad_head_rows(w, n_heads, dp):
    # w: [n_heads*dh, d] (input rows grouped per head) -> [n_heads*dhp, dp]
    d = w.shape[1]
    dh = w.shape[0] // n_heads
    dhp = dp // n_heads
    w = w.reshape(n_heads, dh, d)
    w = jnp.pad(w, ((0, 0), (0, dhp - dh), (0, dp - d)))
    return w.reshape(n_heads * dhp, dp)


def _pack_layer(lyr, n_heads, dp, ff):
    wq = _pad_head_cols(lyr["wq"], n_heads, dp)
    wk = _pad_head_cols(lyr["wk"], n_heads, dp)
    wv = _pad_head_cols(lyr["wv"], n_heads, dp)
    wqkvT = jnp.concatenate([wq, wk, wv], axis=1).T.astype(jnp.bfloat16)      # [3dp, dp]
    bqkv = jnp.concatenate([_pad_head_vec(lyr["bq"], n_heads, dp),
                            _pad_head_vec(lyr["bk"], n_heads, dp),
                            _pad_head_vec(lyr["bv"], n_heads, dp)])[:, None]   # [3dp, 1]
    vec = lambda v: _pad_to(v[None, :], (1, dp))
    return dict(
        wqkvT=wqkvT, bqkv=bqkv.astype(jnp.float32),
        wo=_pad_head_rows(lyr["wo"], n_heads, dp).astype(jnp.bfloat16),        # [dp, dp]
        bo=vec(lyr["bo"]),
        g1=vec(lyr["g1"]), be1=vec(lyr["be1"]),
        w1=_pad_to(lyr["w1"], (dp, ff)).astype(jnp.bfloat16),                  # [dp, ff]
        b1=lyr["b1"][None, :],
        w2T=_pad_to(lyr["w2"], (ff, dp)).T.astype(jnp.bfloat16),               # [dp, ff] (lane-dense)
        b2=vec(lyr["b2"]),
        g2=vec(lyr["g2"]), be2=vec(lyr["be2"]),
    )


def _stack_branch(layers, n_heads, dp, ff):
    packed = [_pack_layer(l, n_heads, dp, ff) for l in layers]
    return {k: jnp.stack([p[k] for p in packed], axis=0) for k in _LAYER_KEYS}


def build_kernel_constants(params, *, n_heads):
    """One-time packing of weights into padded, branch/layer-stacked kernel operands."""
    d_model = params["chart_w2"].shape[1]
    lm_hidden = params["lm_emb"].shape[1]
    ff = params["chart_layers"][0]["w1"].shape[1]
    dp = max(d_model, lm_hidden)
    cin = max(params["chart_w1"].shape[0], dp)

    chart = _stack_branch(params["chart_layers"], n_heads, dp, ff)
    news = _stack_branch(params["news_layers"], n_heads, dp, ff)
    layers = {k: jnp.stack([chart[k], news[k]], axis=0) for k in _LAYER_KEYS}   # [2, L, ...]

    dmask = jnp.stack([_pad_to(jnp.ones((1, d_model), jnp.float32), (1, dp)),
                       _pad_to(jnp.ones((1, lm_hidden), jnp.float32), (1, dp))], axis=0)
    inv_d = jnp.array([[[1.0 / d_model]], [[1.0 / lm_hidden]]], jnp.float32)
    ascale = jnp.array([[[1.0 / math.sqrt(d_model // n_heads)]],
                        [[1.0 / math.sqrt(lm_hidden // n_heads)]]], jnp.float32)
    pool_w = jnp.stack([_pad_to(params["chart_pool_w"], (1, dp)),
                        _pad_to(params["news_pool_w"], (1, dp))], axis=0)
    pool_b = jnp.stack([params["chart_pool_b"], params["news_pool_b"]], axis=0)

    return dict(
        layers=layers, dmask=dmask, inv_d=inv_d, ascale=ascale,
        pool_w=pool_w, pool_b=pool_b,
        ce_w1=_pad_to(params["chart_w1"], (cin, params["chart_w1"].shape[1])),
        ce_b1=params["chart_b1"],
        ce_w2=params["chart_w2"] if params["chart_w2"].shape[1] == dp
        else _pad_to(params["chart_w2"], (params["chart_w2"].shape[0], dp)),
        ce_b2=_pad_to(params["chart_b2"], (1, dp)),
    )


# -----------------------------------------------------------------------------
# Parameter construction (deterministic, synthetic, "true" PyTorch-like shapes)
# -----------------------------------------------------------------------------
def _positional_encoding(max_len, d_model):
    position = jnp.arange(max_len, dtype=jnp.float32)[:, None]
    div_term = jnp.exp(jnp.arange(0, d_model, 2, dtype=jnp.float32)
                       * (-math.log(10000.0) / d_model))
    pe = jnp.zeros((max_len, d_model), jnp.float32)
    pe = pe.at[:, 0::2].set(jnp.sin(position * div_term))
    pe = pe.at[:, 1::2].set(jnp.cos(position * div_term))
    return pe[:, None, :]                                    # [max_len, 1, d_model]


def _init_encoder_layer(key, d_model, dim_ff):
    ks = jax.random.split(key, 6)
    rnd = lambda k, shape: jax.random.normal(k, shape, jnp.float32) * 0.05
    z = lambda n: jnp.zeros((n,), jnp.float32)
    return dict(
        wq=rnd(ks[0], (d_model, d_model)), bq=z(d_model),
        wk=rnd(ks[1], (d_model, d_model)), bk=z(d_model),
        wv=rnd(ks[2], (d_model, d_model)), bv=z(d_model),
        wo=rnd(ks[3], (d_model, d_model)), bo=z(d_model),
        g1=jnp.ones((d_model,), jnp.float32), be1=z(d_model),
        w1=rnd(ks[4], (d_model, dim_ff)), b1=z(dim_ff),
        w2=rnd(ks[5], (dim_ff, d_model)), b2=z(d_model),
        g2=jnp.ones((d_model,), jnp.float32), be2=z(d_model),
    )


def init_params(key, *, chart_features, d_model, n_heads, num_encoders,
                lm_hidden, vocab_size, num_classes, max_len, dim_ff=2048):
    del n_heads  # head split happens at packing time
    keys = jax.random.split(key, 10)
    rnd = lambda k, shape: jax.random.normal(k, shape, jnp.float32) * 0.05
    params = dict(
        chart_w1=rnd(keys[0], (chart_features, d_model // 2)),
        chart_b1=jnp.zeros((1, d_model // 2), jnp.float32),
        chart_w2=rnd(keys[1], (d_model // 2, d_model)),
        chart_b2=jnp.zeros((1, d_model), jnp.float32),
        pe_chart=_positional_encoding(max_len, d_model),
        pe_news=_positional_encoding(max_len, lm_hidden),
        chart_pool_w=rnd(keys[2], (1, d_model)),
        chart_pool_b=jnp.zeros((1, 1), jnp.float32),
        news_pool_w=rnd(keys[3], (1, lm_hidden)),
        news_pool_b=jnp.zeros((1, 1), jnp.float32),
        lm_emb=rnd(keys[4], (vocab_size, lm_hidden)),
        lm_w=rnd(keys[5], (lm_hidden, lm_hidden)),
        lm_b=jnp.zeros((lm_hidden,), jnp.float32),
        fc_w=rnd(keys[6], (d_model + lm_hidden, num_classes)),
        fc_b=jnp.zeros((1, num_classes), jnp.float32),
        chart_layers=[_init_encoder_layer(k, d_model, dim_ff)
                      for k in jax.random.split(keys[7], num_encoders)],
        news_layers=[_init_encoder_layer(k, lm_hidden, dim_ff)
                     for k in jax.random.split(keys[8], num_encoders)],
    )
    return params


# -----------------------------------------------------------------------------
# Forward pass
# -----------------------------------------------------------------------------
def lm_stub(input_ids, attn_mask, emb_table, w_lm, b_lm):
    # TODO(synk): the pretrained DeBERTa (AutoModel.from_pretrained) CLS-token encoder
    # has no Pallas equivalent; replaced by a deterministic embedding + masked-mean +
    # tanh(linear) stub producing one [hidden_size] vector per news item.
    emb = jnp.take(emb_table, input_ids, axis=0)                     # [B, Nc, T, H]
    m = attn_mask[..., None].astype(jnp.float32)
    pooled = jnp.sum(emb * m, axis=2) / jnp.maximum(jnp.sum(m, axis=2), 1.0)
    return jnp.tanh(pooled @ w_lm + b_lm)                            # [B, Nc, H]


def multimodal_trader_forward(kconsts, params, chart_seq, news_input_ids,
                              news_attn_masks, *, n_heads):
    b, s, f = chart_seq.shape
    nc = news_input_ids.shape[1]
    lm_hidden = params["lm_emb"].shape[1]
    d_model = params["chart_w2"].shape[1]

    layers = kconsts["layers"]
    num_layers = layers["wqkvT"].shape[1]
    dp = kconsts["dmask"].shape[2]
    cin = kconsts["ce_w1"].shape[0]

    n_chart, n_news = b * s, b * nc
    npad = ((max(n_chart, n_news) + 7) // 8) * 8          # sublane-aligned token slab

    # DeBERTa stand-in (plain JAX, outside the kernel)
    news_v = lm_stub(news_input_ids, news_attn_masks,
                     params["lm_emb"], params["lm_w"], params["lm_b"])       # [B, Nc, H]

    # Input slabs, padded to the common [npad, cin] shape and stacked over branches.
    chart_x = _pad_to(chart_seq.reshape(n_chart, f).astype(jnp.float32), (npad, cin))
    news_x = _pad_to(news_v.reshape(n_news, lm_hidden).astype(jnp.float32), (npad, cin))
    x_in = jnp.stack([chart_x, news_x], axis=0)

    # PositionalEncoding quirk: pe indexed by batch (x.size(0)), broadcast over sequence.
    pe_c = _pad_to(jnp.repeat(params["pe_chart"][:b, 0, :], s, axis=0), (npad, dp))
    pe_n = _pad_to(jnp.repeat(params["pe_news"][:b, 0, :], nc, axis=0), (npad, dp))
    pe = jnp.stack([pe_c, pe_n], axis=0)

    # Per-branch group ids (token -> batch item); padded tokens land in groups >= B.
    idx = jnp.arange(npad, dtype=jnp.int32)
    gid_c, gid_n = idx // s, idx // nc
    gid_row = jnp.stack([gid_c[None, :], gid_n[None, :]], axis=0)            # [2, 1, npad]
    gid_col = jnp.stack([gid_c[:, None], gid_n[:, None]], axis=0)            # [2, npad, 1]

    inputs = [
        kconsts["inv_d"], kconsts["ascale"], x_in, pe, gid_row, gid_col, kconsts["dmask"],
        kconsts["ce_w1"], kconsts["ce_b1"], kconsts["ce_w2"], kconsts["ce_b2"],
        *[layers[k] for k in _LAYER_KEYS],
        kconsts["pool_w"], kconsts["pool_b"],
    ]

    def per_branch(arr):
        nz = (0,) * (arr.ndim - 1)
        return pl.BlockSpec((None,) + arr.shape[1:],
                            lambda bi, li, _nz=nz: (bi,) + _nz)

    def per_layer(arr):
        nz = (0,) * (arr.ndim - 2)
        return pl.BlockSpec((None, None) + arr.shape[2:],
                            lambda bi, li, _nz=nz: (bi, li) + _nz)

    def const(arr):
        nz = (0,) * arr.ndim
        return pl.BlockSpec(arr.shape, lambda bi, li, _nz=nz: _nz)

    in_specs = [
        per_branch(kconsts["inv_d"]), per_branch(kconsts["ascale"]),
        per_branch(x_in), per_branch(pe), per_branch(gid_row), per_branch(gid_col),
        per_branch(kconsts["dmask"]),
        const(kconsts["ce_w1"]), const(kconsts["ce_b1"]),
        const(kconsts["ce_w2"]), const(kconsts["ce_b2"]),
        *[per_layer(layers[k]) for k in _LAYER_KEYS],
        per_branch(kconsts["pool_w"]), per_branch(kconsts["pool_b"]),
    ]
    out_spec = pl.BlockSpec((None, b, dp), lambda bi, li: (bi, 0, 0))

    kernel = functools.partial(_branch_layer_kernel, n_heads=n_heads,
                               num_layers=num_layers, batch=b)

    pooled = pl.pallas_call(
        kernel,
        out_shape=jax.ShapeDtypeStruct((2, b, dp), jnp.float32),
        grid_spec=pltpu.PrefetchScalarGridSpec(
            num_scalar_prefetch=0,
            grid=(2, num_layers),
            in_specs=in_specs,
            out_specs=out_spec,
            scratch_shapes=[pltpu.VMEM((npad, dp), jnp.float32)],
        ),
        compiler_params=pltpu.CompilerParams(
            # branch axis -> 2 TensorCores on v7x; layer axis carries the activation scratch.
            dimension_semantics=("parallel", "arbitrary"),
            # Real footprint is ~3 MiB (double-buffered per-layer weights + slabs);
            # leave headroom but stay well under every generation's scoped default.
            vmem_limit_bytes=8 * 1024 * 1024,
        ),
    )(*inputs)                                                               # [2, B, dp]

    # Fusion + classifier.  MultiSampleDropout in eval mode == a single fc application.
    chart_p = pooled[0, :, :d_model]
    news_p = pooled[1, :, :lm_hidden]
    emb = jnp.concatenate([chart_p, news_p], axis=-1)
    return emb @ params["fc_w"] + params["fc_b"]                             # [B, num_classes]


# -----------------------------------------------------------------------------
if __name__ == "__main__":
    # Small shapes consistent with the module.
    B = 2                 # batch
    S = 8                 # sequence_length (chart)
    F = 8                 # chart_features
    D_MODEL = 32
    N_HEADS = 4
    NUM_ENCODERS = 2
    NEWS_COUNT = 4
    NUM_INPUT_TOKENS = 16
    LM_HIDDEN = 32        # config.hidden_size of the (stubbed) LM
    VOCAB = 64
    NUM_CLASSES = 3
    MAX_LEN = 64

    root = jax.random.PRNGKey(0)
    k_params, k_chart, k_ids, k_mask = jax.random.split(root, 4)

    params = init_params(
        k_params,
        chart_features=F, d_model=D_MODEL, n_heads=N_HEADS, num_encoders=NUM_ENCODERS,
        lm_hidden=LM_HIDDEN, vocab_size=VOCAB, num_classes=NUM_CLASSES, max_len=MAX_LEN,
        dim_ff=2048,  # nn.TransformerEncoderLayer default dim_feedforward
    )
    kconsts = build_kernel_constants(params, n_heads=N_HEADS)   # one-time weight packing

    chart_seq = jax.random.normal(k_chart, (B, S, F), jnp.float32)
    news_input_ids = jax.random.randint(k_ids, (B, NEWS_COUNT, NUM_INPUT_TOKENS), 0, VOCAB,
                                        dtype=jnp.int32)
    tok_pos = jnp.arange(NUM_INPUT_TOKENS)[None, None, :]
    news_attn_masks = (tok_pos < (NUM_INPUT_TOKENS // 2 + 2)).astype(jnp.int32)
    news_attn_masks = jnp.broadcast_to(news_attn_masks, (B, NEWS_COUNT, NUM_INPUT_TOKENS))

    fwd = jax.jit(functools.partial(multimodal_trader_forward, n_heads=N_HEADS))
    out = fwd(kconsts, params, chart_seq, news_input_ids, news_attn_masks)
    out = jax.block_until_ready(out)
    assert out.shape == (B, NUM_CLASSES), out.shape
    assert bool(jnp.all(jnp.isfinite(out)))
    print("KERNEL_OK")
</pallas_src>

<mosaic_0001>
module attributes {stable_mosaic.version = 11 : i64} {
  func.func @_branch_layer_kernel(%arg0: i32, %arg1: i32, %arg2: memref<1x1x1xf32, #tpu.memory_space<vmem>>, %arg3: memref<1x1x1xf32, #tpu.memory_space<vmem>>, %arg4: memref<1x16x32xf32, #tpu.memory_space<vmem>>, %arg5: memref<1x16x32xf32, #tpu.memory_space<vmem>>, %arg6: memref<1x1x16xi32, #tpu.memory_space<vmem>>, %arg7: memref<1x16x1xi32, #tpu.memory_space<vmem>>, %arg8: memref<1x1x32xf32, #tpu.memory_space<vmem>>, %arg9: memref<32x16xf32, #tpu.memory_space<vmem>>, %arg10: memref<1x16xf32, #tpu.memory_space<vmem>>, %arg11: memref<16x32xf32, #tpu.memory_space<vmem>>, %arg12: memref<1x32xf32, #tpu.memory_space<vmem>>, %arg13: memref<1x1x96x32xbf16, #tpu.memory_space<vmem>>, %arg14: memref<1x1x96x1xf32, #tpu.memory_space<vmem>>, %arg15: memref<1x1x32x32xbf16, #tpu.memory_space<vmem>>, %arg16: memref<1x1x1x32xf32, #tpu.memory_space<vmem>>, %arg17: memref<1x1x1x32xf32, #tpu.memory_space<vmem>>, %arg18: memref<1x1x1x32xf32, #tpu.memory_space<vmem>>, %arg19: memref<1x1x32x2048xbf16, #tpu.memory_space<vmem>>, %arg20: memref<1x1x1x2048xf32, #tpu.memory_space<vmem>>, %arg21: memref<1x1x32x2048xbf16, #tpu.memory_space<vmem>>, %arg22: memref<1x1x1x32xf32, #tpu.memory_space<vmem>>, %arg23: memref<1x1x1x32xf32, #tpu.memory_space<vmem>>, %arg24: memref<1x1x1x32xf32, #tpu.memory_space<vmem>>, %arg25: memref<1x1x32xf32, #tpu.memory_space<vmem>>, %arg26: memref<1x1x1xf32, #tpu.memory_space<vmem>>, %arg27: memref<1x2x32xf32, #tpu.memory_space<vmem>>, %arg28: memref<16x32xf32, #tpu.memory_space<vmem>>) attributes {dimension_semantics = [#tpu.dimension_semantics<parallel>, #tpu.dimension_semantics<arbitrary>], iteration_bounds = array<i64: 2, 2>, scalar_prefetch = 0 : i64, scratch_operands = 1 : i64, tpu.core_type = #tpu.core_type<tc>, window_params = [{transform_indices = @transform_0, window_bounds = array<i64: 1, 1, 1>}, {transform_indices = @transform_1, window_bounds = array<i64: 1, 1, 1>}, {transform_indices = @transform_2, window_bounds = array<i64: 1, 16, 32>}, {transform_indices = @transform_3, window_bounds = array<i64: 1, 16, 32>}, {transform_indices = @transform_4, window_bounds = array<i64: 1, 1, 16>}, {transform_indices = @transform_5, window_bounds = array<i64: 1, 16, 1>}, {transform_indices = @transform_6, window_bounds = array<i64: 1, 1, 32>}, {pipeline_mode = #tpu.pipeline_mode<synchronous>, transform_indices = @transform_7, window_bounds = array<i64: 32, 16>}, {pipeline_mode = #tpu.pipeline_mode<synchronous>, transform_indices = @transform_8, window_bounds = array<i64: 1, 16>}, {pipeline_mode = #tpu.pipeline_mode<synchronous>, transform_indices = @transform_9, window_bounds = array<i64: 16, 32>}, {pipeline_mode = #tpu.pipeline_mode<synchronous>, transform_indices = @transform_10, window_bounds = array<i64: 1, 32>}, {transform_indices = @transform_11, window_bounds = array<i64: 1, 1, 96, 32>}, {transform_indices = @transform_12, window_bounds = array<i64: 1, 1, 96, 1>}, {transform_indices = @transform_13, window_bounds = array<i64: 1, 1, 32, 32>}, {transform_indices = @transform_14, window_bounds = array<i64: 1, 1, 1, 32>}, {transform_indices = @transform_15, window_bounds = array<i64: 1, 1, 1, 32>}, {transform_indices = @transform_16, window_bounds = array<i64: 1, 1, 1, 32>}, {transform_indices = @transform_17, window_bounds = array<i64: 1, 1, 32, 2048>}, {transform_indices = @transform_18, window_bounds = array<i64: 1, 1, 1, 2048>}, {transform_indices = @transform_19, window_bounds = array<i64: 1, 1, 32, 2048>}, {transform_indices = @transform_20, window_bounds = array<i64: 1, 1, 1, 32>}, {transform_indices = @transform_21, window_bounds = array<i64: 1, 1, 1, 32>}, {transform_indices = @transform_22, window_bounds = array<i64: 1, 1, 1, 32>}, {transform_indices = @transform_23, window_bounds = array<i64: 1, 1, 32>}, {transform_indices = @transform_24, window_bounds = array<i64: 1, 1, 1>}, {transform_indices = @transform_25, window_bounds = array<i64: 1, 2, 32>}]} {
    %c0_i32 = arith.constant 0 : i32
    %0 = arith.cmpi eq, %arg1, %c0_i32 : i32
    %c0_i32_0 = arith.constant 0 : i32
    %1 = arith.cmpi eq, %arg0, %c0_i32_0 : i32
    %2 = arith.andi %0, %1 : i1
    %3 = arith.extui %2 : i1 to i32
    %c0_i32_1 = arith.constant 0 : i32
    %4 = arith.cmpi ne, %3, %c0_i32_1 : i32
    scf.if %4 {
      %c0_88 = arith.constant 0 : index
      %c0_89 = arith.constant 0 : index
      %c0_90 = arith.constant 0 : index
      %144 = vector.load %arg4[%c0_88, %c0_89, %c0_90] : memref<1x16x32xf32, #tpu.memory_space<vmem>>, vector<1x16x32xf32>
      %145 = vector.shape_cast %144 : vector<1x16x32xf32> to vector<16x32xf32>
      %c0_91 = arith.constant 0 : index
      %c0_92 = arith.constant 0 : index
      %146 = vector.load %arg9[%c0_91, %c0_92] : memref<32x16xf32, #tpu.memory_space<vmem>>, vector<32x16xf32>
      %cst_93 = arith.constant dense<0.000000e+00> : vector<16x16xf32>
      %147 = tpu.matmul %145, %146, %cst_93 {dimension_numbers = #tpu.dot_dimension_numbers<[1], [0], [0], [1], [0, 0, 1, 1], [], []>} : vector<16x32xf32>, vector<32x16xf32>, vector<16x16xf32> -> vector<16x16xf32>
      %c0_94 = arith.constant 0 : index
      %c0_95 = arith.constant 0 : index
      %148 = vector.load %arg10[%c0_94, %c0_95] : memref<1x16xf32, #tpu.memory_space<vmem>>, vector<1x16xf32>
      %149 = vector.broadcast %148 : vector<1x16xf32> to vector<16x16xf32>
      %150 = arith.addf %147, %149 : vector<16x16xf32>
      %cst_96 = arith.constant 0.000000e+00 : f32
      %151 = vector.broadcast %cst_96 : f32 to vector<16x16xf32>
      %152 = arith.maximumf %150, %151 : vector<16x16xf32>
      %c0_97 = arith.constant 0 : index
      %c0_98 = arith.constant 0 : index
      %153 = vector.load %arg11[%c0_97, %c0_98] : memref<16x32xf32, #tpu.memory_space<vmem>>, vector<16x32xf32>
      %cst_99 = arith.constant dense<0.000000e+00> : vector<16x32xf32>
      %154 = tpu.matmul %152, %153, %cst_99 {dimension_numbers = #tpu.dot_dimension_numbers<[1], [0], [0], [1], [0, 0, 1, 1], [], []>} : vector<16x16xf32>, vector<16x32xf32>, vector<16x32xf32> -> vector<16x32xf32>
      %c0_100 = arith.constant 0 : index
      %c0_101 = arith.constant 0 : index
      %155 = vector.load %arg12[%c0_100, %c0_101] : memref<1x32xf32, #tpu.memory_space<vmem>>, vector<1x32xf32>
      %156 = vector.broadcast %155 : vector<1x32xf32> to vector<16x32xf32>
      %157 = arith.addf %154, %156 : vector<16x32xf32>
      %c0_102 = arith.constant 0 : index
      %c0_103 = arith.constant 0 : index
      %c0_104 = arith.constant 0 : index
      %158 = vector.load %arg5[%c0_102, %c0_103, %c0_104] : memref<1x16x32xf32, #tpu.memory_space<vmem>>, vector<1x16x32xf32>
      %159 = vector.shape_cast %158 : vector<1x16x32xf32> to vector<16x32xf32>
      %160 = arith.addf %157, %159 : vector<16x32xf32>
      %c0_105 = arith.constant 0 : index
      %c0_106 = arith.constant 0 : index
      %161 = vector.load %arg28[%c0_105, %c0_106] : memref<16x32xf32, #tpu.memory_space<vmem>>, vector<16x32xf32>
      tpu.vector_store %arg28[%c0_105, %c0_106], %160 {strides = array<i32>} : memref<16x32xf32, #tpu.memory_space<vmem>>, vector<16x32xf32>,
    } else {
    }
    %c0_i32_2 = arith.constant 0 : i32
    %5 = arith.cmpi eq, %arg1, %c0_i32_2 : i32
    %c0_i32_3 = arith.constant 0 : i32
    %6 = arith.cmpi ne, %arg0, %c0_i32_3 : i32
    %7 = arith.andi %5, %6 : i1
    %8 = arith.extui %7 : i1 to i32
    %c0_i32_4 = arith.constant 0 : i32
    %9 = arith.cmpi ne, %8, %c0_i32_4 : i32
    scf.if %9 {
      %c0_88 = arith.constant 0 : index
      %c0_89 = arith.constant 0 : index
      %c0_90 = arith.constant 0 : index
      %144 = vector.load %arg4[%c0_88, %c0_89, %c0_90] : memref<1x16x32xf32, #tpu.memory_space<vmem>>, vector<1x16x32xf32>
      %145 = vector.shape_cast %144 : vector<1x16x32xf32> to vector<16x32xf32>
      %c0_91 = arith.constant 0 : index
      %c0_92 = arith.constant 0 : index
      %c0_93 = arith.constant 0 : index
      %146 = vector.load %arg5[%c0_91, %c0_92, %c0_93] : memref<1x16x32xf32, #tpu.memory_space<vmem>>, vector<1x16x32xf32>
      %147 = vector.shape_cast %146 : vector<1x16x32xf32> to vector<16x32xf32>
      %148 = arith.addf %145, %147 : vector<16x32xf32>
      %c0_94 = arith.constant 0 : index
      %c0_95 = arith.constant 0 : index
      %149 = vector.load %arg28[%c0_94, %c0_95] : memref<16x32xf32, #tpu.memory_space<vmem>>, vector<16x32xf32>
      tpu.vector_store %arg28[%c0_94, %c0_95], %148 {strides = array<i32>} : memref<16x32xf32, #tpu.memory_space<vmem>>, vector<16x32xf32>,
    } else {
    }
    %c0 = arith.constant 0 : index
    %c0_5 = arith.constant 0 : index
    %c0_6 = arith.constant 0 : index
    %10 = vector.load %arg2[%c0, %c0_5, %c0_6] : memref<1x1x1xf32, #tpu.memory_space<vmem>>, vector<1x1x1xf32>
    %11 = vector.shape_cast %10 : vector<1x1x1xf32> to vector<1x1xf32>
    %c0_7 = arith.constant 0 : index
    %c0_8 = arith.constant 0 : index
    %c0_9 = arith.constant 0 : index
    %12 = vector.load %arg8[%c0_7, %c0_8, %c0_9] : memref<1x1x32xf32, #tpu.memory_space<vmem>>, vector<1x1x32xf32>
    %13 = vector.shape_cast %12 : vector<1x1x32xf32> to vector<1x32xf32>
    %c0_10 = arith.constant 0 : index
    %c0_11 = arith.constant 0 : index
    %14 = vector.load %arg28[%c0_10, %c0_11] : memref<16x32xf32, #tpu.memory_space<vmem>>, vector<16x32xf32>
    %c0_12 = arith.constant 0 : index
    %c0_13 = arith.constant 0 : index
    %c0_14 = arith.constant 0 : index
    %15 = vector.load %arg6[%c0_12, %c0_13, %c0_14] : memref<1x1x16xi32, #tpu.memory_space<vmem>>, vector<1x1x16xi32>
    %16 = vector.shape_cast %15 : vector<1x1x16xi32> to vector<1x16xi32>
    %c0_15 = arith.constant 0 : index
    %c0_16 = arith.constant 0 : index
    %c0_17 = arith.constant 0 : index
    %17 = vector.load %arg7[%c0_15, %c0_16, %c0_17] : memref<1x16x1xi32, #tpu.memory_space<vmem>>, vector<1x16x1xi32>
    %18 = vector.shape_cast %17 : vector<1x16x1xi32> to vector<16x1xi32>
    %19 = vector.broadcast %18 : vector<16x1xi32> to vector<16x16xi32>
    %20 = vector.broadcast %16 : vector<1x16xi32> to vector<16x16xi32>
    %21 = arith.cmpi eq, %19, %20 : vector<16x16xi32>
    %cst = arith.constant 0.000000e+00 : f32
    %cst_18 = arith.constant -1.000000e+30 : f32
    %22 = vector.broadcast %cst : f32 to vector<16x16xf32>
    %23 = vector.broadcast %cst_18 : f32 to vector<16x16xf32>
    %24 = arith.select %21, %22, %23 : vector<16x16xi1>, vector<16x16xf32>
    %c0_19 = arith.constant 0 : index
    %c0_20 = arith.constant 0 : index
    %c0_21 = arith.constant 0 : index
    %c0_22 = arith.constant 0 : index
    %25 = vector.load %arg13[%c0_19, %c0_20, %c0_21, %c0_22] : memref<1x1x96x32xbf16, #tpu.memory_space<vmem>>, vector<1x1x96x32xbf16>
    %26 = vector.shape_cast %25 : vector<1x1x96x32xbf16> to vector<96x32xbf16>
    %27 = arith.truncf %14 : vector<16x32xf32> to vector<16x32xbf16>
    %cst_23 = arith.constant dense<0.000000e+00> : vector<96x16xf32>
    %28 = tpu.matmul %26, %27, %cst_23 {dimension_numbers = #tpu.dot_dimension_numbers<[1], [1], [0], [0], [0, 0, 1, 0], [], []>} : vector<96x32xbf16>, vector<16x32xbf16>, vector<96x16xf32> -> vector<96x16xf32>
    %c0_24 = arith.constant 0 : index
    %c0_25 = arith.constant 0 : index
    %c0_26 = arith.constant 0 : index
    %c0_27 = arith.constant 0 : index
    %29 = vector.load %arg14[%c0_24, %c0_25, %c0_26, %c0_27] : memref<1x1x96x1xf32, #tpu.memory_space<vmem>>, vector<1x1x96x1xf32>
    %30 = vector.shape_cast %29 : vector<1x1x96x1xf32> to vector<96x1xf32>
    %31 = vector.broadcast %30 : vector<96x1xf32> to vector<96x16xf32>
    %32 = arith.addf %28, %31 : vector<96x16xf32>
    %33 = vector.shape_cast %32 : vector<96x16xf32> to vector<3x4x8x16xf32>
    %34 = vector.extract_strided_slice %33 {offsets = [0, 0, 0, 0], sizes = [1, 4, 8, 16], strides = [1, 1, 1, 1]} : vector<3x4x8x16xf32> to vector<1x4x8x16xf32>
    %35 = vector.shape_cast %34 : vector<1x4x8x16xf32> to vector<4x8x16xf32>
    %c0_28 = arith.constant 0 : index
    %c0_29 = arith.constant 0 : index
    %c0_30 = arith.constant 0 : index
    %36 = vector.load %arg3[%c0_28, %c0_29, %c0_30] : memref<1x1x1xf32, #tpu.memory_space<vmem>>, vector<1x1x1xf32>
    %37 = vector.shape_cast %36 : vector<1x1x1xf32> to vector<1x1xf32>
    %38 = vector.shape_cast %37 : vector<1x1xf32> to vector<1x1x1xf32>
    %39 = vector.broadcast %38 : vector<1x1x1xf32> to vector<4x8x16xf32>
    %40 = arith.mulf %35, %39 : vector<4x8x16xf32>
    %41 = vector.extract_strided_slice %33 {offsets = [1, 0, 0, 0], sizes = [1, 4, 8, 16], strides = [1, 1, 1, 1]} : vector<3x4x8x16xf32> to vector<1x4x8x16xf32>
    %42 = vector.shape_cast %41 : vector<1x4x8x16xf32> to vector<4x8x16xf32>
    %43 = vector.extract_strided_slice %33 {offsets = [2, 0, 0, 0], sizes = [1, 4, 8, 16], strides = [1, 1, 1, 1]} : vector<3x4x8x16xf32> to vector<1x4x8x16xf32>
    %44 = vector.shape_cast %43 : vector<1x4x8x16xf32> to vector<4x8x16xf32>
    %cst_31 = arith.constant dense<0.000000e+00> : vector<4x16x16xf32>
    %45 = tpu.matmul %40, %42, %cst_31 {dimension_numbers = #tpu.dot_dimension_numbers<[1], [1], [2], [2], [0, 0, 0, 2, 1, 2], [0], [0]>} : vector<4x8x16xf32>, vector<4x8x16xf32>, vector<4x16x16xf32> -> vector<4x16x16xf32>
    %46 = vector.shape_cast %24 : vector<16x16xf32> to vector<1x16x16xf32>
    %47 = vector.broadcast %46 : vector<1x16x16xf32> to vector<4x16x16xf32>
    %48 = arith.addf %45, %47 : vector<4x16x16xf32>
    %cst_32 = arith.constant dense<0xFF800000> : vector<4x16xf32>
    %49 = vector.multi_reduction <maximumf>, %48, %cst_32 [2] : vector<4x16x16xf32> to vector<4x16xf32>
    %50 = vector.shape_cast %49 : vector<4x16xf32> to vector<4x16x1xf32>
    %51 = vector.broadcast %50 : vector<4x16x1xf32> to vector<4x16x16xf32>
    %52 = arith.subf %48, %51 : vector<4x16x16xf32>
    %53 = math.exp %52 : vector<4x16x16xf32>
    %cst_33 = arith.constant dense<0.000000e+00> : vector<4x16xf32>
    %54 = vector.multi_reduction <add>, %53, %cst_33 [2] : vector<4x16x16xf32> to vector<4x16xf32>
    %55 = vector.shape_cast %54 : vector<4x16xf32> to vector<4x16x1xf32>
    %56 = vector.broadcast %55 : vector<4x16x1xf32> to vector<4x16x16xf32>
    %57 = arith.divf %53, %56 : vector<4x16x16xf32>
    %cst_34 = arith.constant dense<0.000000e+00> : vector<4x8x16xf32>
    %58 = tpu.matmul %44, %57, %cst_34 {dimension_numbers = #tpu.dot_dimension_numbers<[2], [2], [1], [1], [0, 0, 0, 1, 1, 1], [0], [0]>} : vector<4x8x16xf32>, vector<4x16x16xf32>, vector<4x8x16xf32> -> vector<4x8x16xf32>
    %59 = vector.shape_cast %58 : vector<4x8x16xf32> to vector<32x16xf32>
    %c0_35 = arith.constant 0 : index
    %c0_36 = arith.constant 0 : index
    %c0_37 = arith.constant 0 : index
    %c0_38 = arith.constant 0 : index
    %60 = vector.load %arg15[%c0_35, %c0_36, %c0_37, %c0_38] : memref<1x1x32x32xbf16, #tpu.memory_space<vmem>>, vector<1x1x32x32xbf16>
    %61 = vector.shape_cast %60 : vector<1x1x32x32xbf16> to vector<32x32xbf16>
    %62 = arith.truncf %59 : vector<32x16xf32> to vector<32x16xbf16>
    %cst_39 = arith.constant dense<0.000000e+00> : vector<16x32xf32>
    %63 = tpu.matmul %62, %61, %cst_39 {dimension_numbers = #tpu.dot_dimension_numbers<[0], [0], [1], [1], [0, 1, 1, 1], [], []>} : vector<32x16xbf16>, vector<32x32xbf16>, vector<16x32xf32> -> vector<16x32xf32>
    %c0_40 = arith.constant 0 : index
    %c0_41 = arith.constant 0 : index
    %c0_42 = arith.constant 0 : index
    %c0_43 = arith.constant 0 : index
    %64 = vector.load %arg16[%c0_40, %c0_41, %c0_42, %c0_43] : memref<1x1x1x32xf32, #tpu.memory_space<vmem>>, vector<1x1x1x32xf32>
    %65 = vector.shape_cast %64 : vector<1x1x1x32xf32> to vector<1x32xf32>
    %66 = vector.broadcast %65 : vector<1x32xf32> to vector<16x32xf32>
    %67 = arith.addf %63, %66 : vector<16x32xf32>
    %68 = arith.addf %14, %67 : vector<16x32xf32>
    %c0_44 = arith.constant 0 : index
    %c0_45 = arith.constant 0 : index
    %c0_46 = arith.constant 0 : index
    %c0_47 = arith.constant 0 : index
    %69 = vector.load %arg17[%c0_44, %c0_45, %c0_46, %c0_47] : memref<1x1x1x32xf32, #tpu.memory_space<vmem>>, vector<1x1x1x32xf32>
    %70 = vector.shape_cast %69 : vector<1x1x1x32xf32> to vector<1x32xf32>
    %c0_48 = arith.constant 0 : index
    %c0_49 = arith.constant 0 : index
    %c0_50 = arith.constant 0 : index
    %c0_51 = arith.constant 0 : index
    %71 = vector.load %arg18[%c0_48, %c0_49, %c0_50, %c0_51] : memref<1x1x1x32xf32, #tpu.memory_space<vmem>>, vector<1x1x1x32xf32>
    %72 = vector.shape_cast %71 : vector<1x1x1x32xf32> to vector<1x32xf32>
    %cst_52 = arith.constant dense<0.000000e+00> : vector<16xf32>
    %73 = vector.multi_reduction <add>, %68, %cst_52 [1] : vector<16x32xf32> to vector<16xf32>
    %74 = vector.shape_cast %73 : vector<16xf32> to vector<16x1xf32>
    %75 = vector.broadcast %11 : vector<1x1xf32> to vector<16x1xf32>
    %76 = arith.mulf %74, %75 : vector<16x1xf32>
    %77 = vector.broadcast %76 : vector<16x1xf32> to vector<16x32xf32>
    %78 = arith.subf %68, %77 : vector<16x32xf32>
    %79 = vector.broadcast %13 : vector<1x32xf32> to vector<16x32xf32>
    %80 = arith.mulf %78, %79 : vector<16x32xf32>
    %81 = arith.mulf %80, %80 : vector<16x32xf32>
    %cst_53 = arith.constant dense<0.000000e+00> : vector<16xf32>
    %82 = vector.multi_reduction <add>, %81, %cst_53 [1] : vector<16x32xf32> to vector<16xf32>
    %83 = vector.shape_cast %82 : vector<16xf32> to vector<16x1xf32>
    %84 = vector.broadcast %11 : vector<1x1xf32> to vector<16x1xf32>
    %85 = arith.mulf %83, %84 : vector<16x1xf32>
    %cst_54 = arith.constant 9.99999974E-6 : f32
    %86 = vector.broadcast %cst_54 : f32 to vector<16x1xf32>
    %87 = arith.addf %85, %86 : vector<16x1xf32>
    %88 = math.rsqrt %87 : vector<16x1xf32>
    %89 = vector.broadcast %88 : vector<16x1xf32> to vector<16x32xf32>
    %90 = arith.mulf %80, %89 : vector<16x32xf32>
    %91 = vector.broadcast %70 : vector<1x32xf32> to vector<16x32xf32>
    %92 = arith.mulf %90, %91 : vector<16x32xf32>
    %93 = vector.broadcast %72 : vector<1x32xf32> to vector<16x32xf32>
    %94 = arith.addf %92, %93 : vector<16x32xf32>
    %c0_55 = arith.constant 0 : index
    %c0_56 = arith.constant 0 : index
    %c0_57 = arith.constant 0 : index
    %c0_58 = arith.constant 0 : index
    %95 = vector.load %arg19[%c0_55, %c0_56, %c0_57, %c0_58] : memref<1x1x32x2048xbf16, #tpu.memory_space<vmem>>, vector<1x1x32x2048xbf16>
    %96 = vector.shape_cast %95 : vector<1x1x32x2048xbf16> to vector<32x2048xbf16>
    %97 = arith.truncf %94 : vector<16x32xf32> to vector<16x32xbf16>
    %cst_59 = arith.constant dense<0.000000e+00> : vector<16x2048xf32>
    %98 = tpu.matmul %97, %96, %cst_59 {dimension_numbers = #tpu.dot_dimension_numbers<[1], [0], [0], [1], [0, 0, 1, 1], [], []>} : vector<16x32xbf16>, vector<32x2048xbf16>, vector<16x2048xf32> -> vector<16x2048xf32>
    %c0_60 = arith.constant 0 : index
    %c0_61 = arith.constant 0 : index
    %c0_62 = arith.constant 0 : index
    %c0_63 = arith.constant 0 : index
    %99 = vector.load %arg20[%c0_60, %c0_61, %c0_62, %c0_63] : memref<1x1x1x2048xf32, #tpu.memory_space<vmem>>, vector<1x1x1x2048xf32>
    %100 = vector.shape_cast %99 : vector<1x1x1x2048xf32> to vector<1x2048xf32>
    %101 = vector.broadcast %100 : vector<1x2048xf32> to vector<16x2048xf32>
    %102 = arith.addf %98, %101 : vector<16x2048xf32>
    %cst_64 = arith.constant 0.000000e+00 : f32
    %103 = vector.broadcast %cst_64 : f32 to vector<16x2048xf32>
    %104 = arith.maximumf %102, %103 : vector<16x2048xf32>
    %105 = arith.truncf %104 : vector<16x2048xf32> to vector<16x2048xbf16>
    %c0_65 = arith.constant 0 : index
    %c0_66 = arith.constant 0 : index
    %c0_67 = arith.constant 0 : index
    %c0_68 = arith.constant 0 : index
    %106 = vector.load %arg21[%c0_65, %c0_66, %c0_67, %c0_68] : memref<1x1x32x2048xbf16, #tpu.memory_space<vmem>>, vector<1x1x32x2048xbf16>
    %107 = vector.shape_cast %106 : vector<1x1x32x2048xbf16> to vector<32x2048xbf16>
    %cst_69 = arith.constant dense<0.000000e+00> : vector<16x32xf32>
    %108 = tpu.matmul %105, %107, %cst_69 {dimension_numbers = #tpu.dot_dimension_numbers<[1], [1], [0], [0], [0, 0, 1, 0], [], []>} : vector<16x2048xbf16>, vector<32x2048xbf16>, vector<16x32xf32> -> vector<16x32xf32>
    %c0_70 = arith.constant 0 : index
    %c0_71 = arith.constant 0 : index
    %c0_72 = arith.constant 0 : index
    %c0_73 = arith.constant 0 : index
    %109 = vector.load %arg22[%c0_70, %c0_71, %c0_72, %c0_73] : memref<1x1x1x32xf32, #tpu.memory_space<vmem>>, vector<1x1x1x32xf32>
    %110 = vector.shape_cast %109 : vector<1x1x1x32xf32> to vector<1x32xf32>
    %111 = vector.broadcast %110 : vector<1x32xf32> to vector<16x32xf32>
    %112 = arith.addf %108, %111 : vector<16x32xf32>
    %113 = arith.addf %94, %112 : vector<16x32xf32>
    %c0_74 = arith.constant 0 : index
    %c0_75 = arith.constant 0 : index
    %c0_76 = arith.constant 0 : index
    %c0_77 = arith.constant 0 : index
    %114 = vector.load %arg23[%c0_74, %c0_75, %c0_76, %c0_77] : memref<1x1x1x32xf32, #tpu.memory_space<vmem>>, vector<1x1x1x32xf32>
    %115 = vector.shape_cast %114 : vector<1x1x1x32xf32> to vector<1x32xf32>
    %c0_78 = arith.constant 0 : index
    %c0_79 = arith.constant 0 : index
    %c0_80 = arith.constant 0 : index
    %c0_81 = arith.constant 0 : index
    %116 = vector.load %arg24[%c0_78, %c0_79, %c0_80, %c0_81] : memref<1x1x1x32xf32, #tpu.memory_space<vmem>>, vector<1x1x1x32xf32>
    %117 = vector.shape_cast %116 : vector<1x1x1x32xf32> to vector<1x32xf32>
    %cst_82 = arith.constant dense<0.000000e+00> : vector<16xf32>
    %118 = vector.multi_reduction <add>, %113, %cst_82 [1] : vector<16x32xf32> to vector<16xf32>
    %119 = vector.shape_cast %118 : vector<16xf32> to vector<16x1xf32>
    %120 = vector.broadcast %11 : vector<1x1xf32> to vector<16x1xf32>
    %121 = arith.mulf %119, %120 : vector<16x1xf32>
    %122 = vector.broadcast %121 : vector<16x1xf32> to vector<16x32xf32>
    %123 = arith.subf %113, %122 : vector<16x32xf32>
    %124 = vector.broadcast %13 : vector<1x32xf32> to vector<16x32xf32>
    %125 = arith.mulf %123, %124 : vector<16x32xf32>
    %126 = arith.mulf %125, %125 : vector<16x32xf32>
    %cst_83 = arith.constant dense<0.000000e+00> : vector<16xf32>
    %127 = vector.multi_reduction <add>, %126, %cst_83 [1] : vector<16x32xf32> to vector<16xf32>
    %128 = vector.shape_cast %127 : vector<16xf32> to vector<16x1xf32>
    %129 = vector.broadcast %11 : vector<1x1xf32> to vector<16x1xf32>
    %130 = arith.mulf %128, %129 : vector<16x1xf32>
    %cst_84 = arith.constant 9.99999974E-6 : f32
    %131 = vector.broadcast %cst_84 : f32 to vector<16x1xf32>
    %132 = arith.addf %130, %131 : vector<16x1xf32>
    %133 = math.rsqrt %132 : vector<16x1xf32>
    %134 = vector.broadcast %133 : vector<16x1xf32> to vector<16x32xf32>
    %135 = arith.mulf %125, %134 : vector<16x32xf32>
    %136 = vector.broadcast %115 : vector<1x32xf32> to vector<16x32xf32>
    %137 = arith.mulf %135, %136 : vector<16x32xf32>
    %138 = vector.broadcast %117 : vector<1x32xf32> to vector<16x32xf32>
    %139 = arith.addf %137, %138 : vector<16x32xf32>
    %c0_85 = arith.constant 0 : index
    %c0_86 = arith.constant 0 : index
    %140 = vector.load %arg28[%c0_85, %c0_86] : memref<16x32xf32, #tpu.memory_space<vmem>>, vector<16x32xf32>
    tpu.vector_store %arg28[%c0_85, %c0_86], %139 {strides = array<i32>} : memref<16x32xf32, #tpu.memory_space<vmem>>, vector<16x32xf32>,
    %c1_i32 = arith.constant 1 : i32
    %141 = arith.cmpi eq, %arg1, %c1_i32 : i32
    %142 = arith.extui %141 : i1 to i32
    %c0_i32_87 = arith.constant 0 : i32
    %143 = arith.cmpi ne, %142, %c0_i32_87 : i32
    scf.if %143 {
      %c0_88 = arith.constant 0 : index
      %c0_89 = arith.constant 0 : index
      %c0_90 = arith.constant 0 : index
      %144 = vector.load %arg25[%c0_88, %c0_89, %c0_90] : memref<1x1x32xf32, #tpu.memory_space<vmem>>, vector<1x1x32xf32>
      %145 = vector.shape_cast %144 : vector<1x1x32xf32> to vector<1x32xf32>
      %cst_91 = arith.constant dense<0.000000e+00> : vector<1x16xf32>
      %146 = tpu.matmul %145, %139, %cst_91 {dimension_numbers = #tpu.dot_dimension_numbers<[1], [1], [0], [0], [0, 0, 1, 0], [], []>} : vector<1x32xf32>, vector<16x32xf32>, vector<1x16xf32> -> vector<1x16xf32>
      %c0_92 = arith.constant 0 : index
      %c0_93 = arith.constant 0 : index
      %c0_94 = arith.constant 0 : index
      %147 = vector.load %arg26[%c0_92, %c0_93, %c0_94] : memref<1x1x1xf32, #tpu.memory_space<vmem>>, vector<1x1x1xf32>
      %148 = vector.shape_cast %147 : vector<1x1x1xf32> to vector<1x1xf32>
      %149 = vector.broadcast %148 : vector<1x1xf32> to vector<1x16xf32>
      %150 = arith.addf %146, %149 : vector<1x16xf32>
      %151 = tpu.iota {dimensions = array<i32: 0>} : vector<2x16xi32>
      %152 = vector.broadcast %16 : vector<1x16xi32> to vector<2x16xi32>
      %153 = arith.cmpi eq, %152, %151 : vector<2x16xi32>
      %cst_95 = arith.constant -1.000000e+30 : f32
      %154 = vector.shape_cast %150 : vector<1x16xf32> to vector<1x16xf32>
      %155 = vector.broadcast %154 : vector<1x16xf32> to vector<2x16xf32>
      %156 = vector.broadcast %cst_95 : f32 to vector<2x16xf32>
      %157 = arith.select %153, %155, %156 : vector<2x16xi1>, vector<2x16xf32>
      %cst_96 = arith.constant dense<0xFF800000> : vector<2xf32>
      %158 = vector.multi_reduction <maximumf>, %157, %cst_96 [1] : vector<2x16xf32> to vector<2xf32>
      %159 = vector.shape_cast %158 : vector<2xf32> to vector<2x1xf32>
      %160 = vector.broadcast %159 : vector<2x1xf32> to vector<2x16xf32>
      %161 = arith.subf %157, %160 : vector<2x16xf32>
      %162 = math.exp %161 : vector<2x16xf32>
      %cst_97 = arith.constant dense<0.000000e+00> : vector<2xf32>
      %163 = vector.multi_reduction <add>, %162, %cst_97 [1] : vector<2x16xf32> to vector<2xf32>
      %164 = vector.shape_cast %163 : vector<2xf32> to vector<2x1xf32>
      %165 = tpu.reciprocal %164 {approx = true} : vector<2x1xf32> -> vector<2x1xf32>
      %166 = vector.broadcast %165 : vector<2x1xf32> to vector<2x16xf32>
      %167 = arith.mulf %162, %166 : vector<2x16xf32>
      %cst_98 = arith.constant dense<0.000000e+00> : vector<2x32xf32>
      %168 = tpu.matmul %167, %139, %cst_98 {dimension_numbers = #tpu.dot_dimension_numbers<[1], [0], [0], [1], [0, 0, 1, 1], [], []>} : vector<2x16xf32>, vector<16x32xf32>, vector<2x32xf32> -> vector<2x32xf32>
      %c0_99 = arith.constant 0 : index
      %c0_100 = arith.constant 0 : index
      %c0_101 = arith.constant 0 : index
      %169 = vector.load %arg27[%c0_99, %c0_100, %c0_101] : memref<1x2x32xf32, #tpu.memory_space<vmem>>, vector<1x2x32xf32>
      %170 = vector.shape_cast %169 : vector<1x2x32xf32> to vector<2x32xf32>
      %171 = vector.shape_cast %168 : vector<2x32xf32> to vector<1x2x32xf32>
      tpu.vector_store %arg27[%c0_99, %c0_100, %c0_101], %171 {strides = array<i32>} : memref<1x2x32xf32, #tpu.memory_space<vmem>>, vector<1x2x32xf32>,
    } else {
    }
    return
  }
  func.func @transform_0(%arg0: i32, %arg1: i32) -> (i32, i32, i32) {
    %c0_i32 = arith.constant 0 : i32
    %c0_i32_0 = arith.constant 0 : i32
    %c0_i32_1 = arith.constant 0 : i32
    return %arg0, %c0_i32, %c0_i32_0 : i32, i32, i32
  }
  func.func @transform_1(%arg0: i32, %arg1: i32) -> (i32, i32, i32) {
    %c0_i32 = arith.constant 0 : i32
    %c0_i32_0 = arith.constant 0 : i32
    %c0_i32_1 = arith.constant 0 : i32
    return %arg0, %c0_i32, %c0_i32_0 : i32, i32, i32
  }
  func.func @transform_2(%arg0: i32, %arg1: i32) -> (i32, i32, i32) {
    %c0_i32 = arith.constant 0 : i32
    %c0_i32_0 = arith.constant 0 : i32
    %c0_i32_1 = arith.constant 0 : i32
    return %arg0, %c0_i32, %c0_i32_0 : i32, i32, i32
  }
  func.func @transform_3(%arg0: i32, %arg1: i32) -> (i32, i32, i32) {
    %c0_i32 = arith.constant 0 : i32
    %c0_i32_0 = arith.constant 0 : i32
    %c0_i32_1 = arith.constant 0 : i32
    return %arg0, %c0_i32, %c0_i32_0 : i32, i32, i32
  }
  func.func @transform_4(%arg0: i32, %arg1: i32) -> (i32, i32, i32) {
    %c0_i32 = arith.constant 0 : i32
    %c0_i32_0 = arith.constant 0 : i32
    %c0_i32_1 = arith.constant 0 : i32
    return %arg0, %c0_i32, %c0_i32_0 : i32, i32, i32
  }
  func.func @transform_5(%arg0: i32, %arg1: i32) -> (i32, i32, i32) {
    %c0_i32 = arith.constant 0 : i32
    %c0_i32_0 = arith.constant 0 : i32
    %c0_i32_1 = arith.constant 0 : i32
    return %arg0, %c0_i32, %c0_i32_0 : i32, i32, i32
  }
  func.func @transform_6(%arg0: i32, %arg1: i32) -> (i32, i32, i32) {
    %c0_i32 = arith.constant 0 : i32
    %c0_i32_0 = arith.constant 0 : i32
    %c0_i32_1 = arith.constant 0 : i32
    return %arg0, %c0_i32, %c0_i32_0 : i32, i32, i32
  }
  func.func @transform_7(%arg0: i32, %arg1: i32) -> (i32, i32) {
    %c0_i32 = arith.constant 0 : i32
    %c0_i32_0 = arith.constant 0 : i32
    %c0_i32_1 = arith.constant 0 : i32
    return %c0_i32, %c0_i32_0 : i32, i32
  }
  func.func @transform_8(%arg0: i32, %arg1: i32) -> (i32, i32) {
    %c0_i32 = arith.constant 0 : i32
    %c0_i32_0 = arith.constant 0 : i32
    %c0_i32_1 = arith.constant 0 : i32
    return %c0_i32, %c0_i32_0 : i32, i32
  }
  func.func @transform_9(%arg0: i32, %arg1: i32) -> (i32, i32) {
    %c0_i32 = arith.constant 0 : i32
    %c0_i32_0 = arith.constant 0 : i32
    %c0_i32_1 = arith.constant 0 : i32
    return %c0_i32, %c0_i32_0 : i32, i32
  }
  func.func @transform_10(%arg0: i32, %arg1: i32) -> (i32, i32) {
    %c0_i32 = arith.constant 0 : i32
    %c0_i32_0 = arith.constant 0 : i32
    %c0_i32_1 = arith.constant 0 : i32
    return %c0_i32, %c0_i32_0 : i32, i32
  }
  func.func @transform_11(%arg0: i32, %arg1: i32) -> (i32, i32, i32, i32) {
    %c0_i32 = arith.constant 0 : i32
    %c0_i32_0 = arith.constant 0 : i32
    %c0_i32_1 = arith.constant 0 : i32
    return %arg0, %arg1, %c0_i32, %c0_i32_0 : i32, i32, i32, i32
  }
  func.func @transform_12(%arg0: i32, %arg1: i32) -> (i32, i32, i32, i32) {
    %c0_i32 = arith.constant 0 : i32
    %c0_i32_0 = arith.constant 0 : i32
    %c0_i32_1 = arith.constant 0 : i32
    return %arg0, %arg1, %c0_i32, %c0_i32_0 : i32, i32, i32, i32
  }
  func.func @transform_13(%arg0: i32, %arg1: i32) -> (i32, i32, i32, i32) {
    %c0_i32 = arith.constant 0 : i32
    %c0_i32_0 = arith.constant 0 : i32
    %c0_i32_1 = arith.constant 0 : i32
    return %arg0, %arg1, %c0_i32, %c0_i32_0 : i32, i32, i32, i32
  }
  func.func @transform_14(%arg0: i32, %arg1: i32) -> (i32, i32, i32, i32) {
    %c0_i32 = arith.constant 0 : i32
    %c0_i32_0 = arith.constant 0 : i32
    %c0_i32_1 = arith.constant 0 : i32
    return %arg0, %arg1, %c0_i32, %c0_i32_0 : i32, i32, i32, i32
  }
  func.func @transform_15(%arg0: i32, %arg1: i32) -> (i32, i32, i32, i32) {
    %c0_i32 = arith.constant 0 : i32
    %c0_i32_0 = arith.constant 0 : i32
    %c0_i32_1 = arith.constant 0 : i32
    return %arg0, %arg1, %c0_i32, %c0_i32_0 : i32, i32, i32, i32
  }
  func.func @transform_16(%arg0: i32, %arg1: i32) -> (i32, i32, i32, i32) {
    %c0_i32 = arith.constant 0 : i32
    %c0_i32_0 = arith.constant 0 : i32
    %c0_i32_1 = arith.constant 0 : i32
    return %arg0, %arg1, %c0_i32, %c0_i32_0 : i32, i32, i32, i32
  }
  func.func @transform_17(%arg0: i32, %arg1: i32) -> (i32, i32, i32, i32) {
    %c0_i32 = arith.constant 0 : i32
    %c0_i32_0 = arith.constant 0 : i32
    %c0_i32_1 = arith.constant 0 : i32
    return %arg0, %arg1, %c0_i32, %c0_i32_0 : i32, i32, i32, i32
  }
  func.func @transform_18(%arg0: i32, %arg1: i32) -> (i32, i32, i32, i32) {
    %c0_i32 = arith.constant 0 : i32
    %c0_i32_0 = arith.constant 0 : i32
    %c0_i32_1 = arith.constant 0 : i32
    return %arg0, %arg1, %c0_i32, %c0_i32_0 : i32, i32, i32, i32
  }
  func.func @transform_19(%arg0: i32, %arg1: i32) -> (i32, i32, i32, i32) {
    %c0_i32 = arith.constant 0 : i32
    %c0_i32_0 = arith.constant 0 : i32
    %c0_i32_1 = arith.constant 0 : i32
    return %arg0, %arg1, %c0_i32, %c0_i32_0 : i32, i32, i32, i32
  }
  func.func @transform_20(%arg0: i32, %arg1: i32) -> (i32, i32, i32, i32) {
    %c0_i32 = arith.constant 0 : i32
    %c0_i32_0 = arith.constant 0 : i32
    %c0_i32_1 = arith.constant 0 : i32
    return %arg0, %arg1, %c0_i32, %c0_i32_0 : i32, i32, i32, i32
  }
  func.func @transform_21(%arg0: i32, %arg1: i32) -> (i32, i32, i32, i32) {
    %c0_i32 = arith.constant 0 : i32
    %c0_i32_0 = arith.constant 0 : i32
    %c0_i32_1 = arith.constant 0 : i32
    return %arg0, %arg1, %c0_i32, %c0_i32_0 : i32, i32, i32, i32
  }
  func.func @transform_22(%arg0: i32, %arg1: i32) -> (i32, i32, i32, i32) {
    %c0_i32 = arith.constant 0 : i32
    %c0_i32_0 = arith.constant 0 : i32
    %c0_i32_1 = arith.constant 0 : i32
    return %arg0, %arg1, %c0_i32, %c0_i32_0 : i32, i32, i32, i32
  }
  func.func @transform_23(%arg0: i32, %arg1: i32) -> (i32, i32, i32) {
    %c0_i32 = arith.constant 0 : i32
    %c0_i32_0 = arith.constant 0 : i32
    %c0_i32_1 = arith.constant 0 : i32
    return %arg0, %c0_i32, %c0_i32_0 : i32, i32, i32
  }
  func.func @transform_24(%arg0: i32, %arg1: i32) -> (i32, i32, i32) {
    %c0_i32 = arith.constant 0 : i32
    %c0_i32_0 = arith.constant 0 : i32
    %c0_i32_1 = arith.constant 0 : i32
    return %arg0, %c0_i32, %c0_i32_0 : i32, i32, i32
  }
  func.func @transform_25(%arg0: i32, %arg1: i32) -> (i32, i32, i32) {
    %c0_i32 = arith.constant 0 : i32
    %c0_i32_0 = arith.constant 0 : i32
    %c0_i32_1 = arith.constant 0 : i32
    return %arg0, %c0_i32, %c0_i32_0 : i32, i32, i32
  }
}

</mosaic_0001>

<bundles_post_ra>
// kernel: multimodal_trader_forward.1
= control target key start
LH: loop header
LB: loop body
LE: loop exit
PB: predicated region body
PF: predicated region fallthrough
CT: control target
= control target key end

     0   :  { %s5209_s29 = smov 0   ;;  %s5215_s30 = smov 0   ;;  %s5856_s0 = inlined_call_operand.vmem [shape: f32[2,1,1], index: 0, kind: input, shape index: {}]   ;;  %s5857_s1 = inlined_call_operand.vmem [shape: f32[2,1,1], index: 1, kind: input, shape index: {}]   ;;  %s5858_s2 = inlined_call_operand.vmem [shape: f32[2,16,32], index: 2, kind: input, shape index: {}]   ;;  %s5859_s3 = inlined_call_operand.vmem [shape: f32[2,16,32], index: 3, kind: input, shape index: {}]   ;;  %s5860_s4 = inlined_call_operand.vmem [shape: s32[2,1,16], index: 4, kind: input, shape index: {}]   ;;  %s5861_s5 = inlined_call_operand.vmem [shape: s32[2,16,1], index: 5, kind: input, shape index: {}]   ;;  %s5862_s6 = inlined_call_operand.vmem [shape: f32[2,1,32], index: 6, kind: input, shape index: {}]   ;;  %s5863_s7 = inlined_call_operand.vmem [shape: f32[32,16], index: 7, kind: input, shape index: {}]   ;;  %s5864_s8 = inlined_call_operand.vmem [shape: f32[1,16], index: 8, kind: input, shape index: {}]   ;;  %s5865_s9 = inlined_call_operand.vmem [shape: f32[16,32], index: 9, kind: input, shape index: {}]   ;;  %s5866_s10 = inlined_call_operand.vmem [shape: f32[1,32], index: 10, kind: input, shape index: {}]   ;;  %s5867_s11 = inlined_call_operand.vmem [shape: bf16[2,2,96,32], index: 11, kind: input, shape index: {}]   ;;  %s5868_s12 = inlined_call_operand.vmem [shape: f32[2,2,96,1], index: 12, kind: input, shape index: {}]   ;;  %s5869_s13 = inlined_call_operand.vmem [shape: bf16[2,2,32,32], index: 13, kind: input, shape index: {}]   ;;  %s5870_s14 = inlined_call_operand.vmem [shape: f32[2,2,1,32], index: 14, kind: input, shape index: {}]   ;;  %s5871_s15 = inlined_call_operand.vmem [shape: f32[2,2,1,32], index: 15, kind: input, shape index: {}]   ;;  %s5872_s16 = inlined_call_operand.vmem [shape: f32[2,2,1,32], index: 16, kind: input, shape index: {}]   ;;  %s5873_s17 = inlined_call_operand.vmem [shape: bf16[2,2,32,2048], index: 17, kind: input, shape index: {}]   ;;  %s5874_s18 = inlined_call_operand.vmem [shape: f32[2,2,1,2048], index: 18, kind: input, shape index: {}]   ;;  %s5875_s19 = inlined_call_operand.vmem [shape: bf16[2,2,32,2048], index: 19, kind: input, shape index: {}]   ;;  %s5876_s20 = inlined_call_operand.vmem [shape: f32[2,2,1,32], index: 20, kind: input, shape index: {}]   ;;  %s5877_s21 = inlined_call_operand.vmem [shape: f32[2,2,1,32], index: 21, kind: input, shape index: {}]   ;;  %s5878_s22 = inlined_call_operand.vmem [shape: f32[2,2,1,32], index: 22, kind: input, shape index: {}]   ;;  %s5879_s23 = inlined_call_operand.vmem [shape: f32[2,1,32], index: 23, kind: input, shape index: {}]   ;;  %s5880_s24 = inlined_call_operand.vmem [shape: f32[2,1,1], index: 24, kind: input, shape index: {}]   ;;  %s5881_s25 = inlined_call_operand.vmem [shape: f32[2,2,32], index: 25, kind: output, shape index: {}]  }
   0x1   :  { %5892 = sst [smem:[#allocation13_spill]] %s5856_s0 }
   0x2   :  { %5893 = sst [smem:[#allocation14_spill]] %s5857_s1 }
   0x3   :  { %5894 = sst [smem:[#allocation15_spill]] %s5858_s2  ;;  %s5211_s2 = smov 0  }
   0x4   :  { %5895 = sst [smem:[#allocation16_spill]] %s5859_s3 }
   0x5   :  { %5896 = sst [smem:[#allocation17_spill]] %s5860_s4 }
   0x6   :  { %5897 = sst [smem:[#allocation18_spill]] %s5861_s5 }
   0x7   :  { %5898 = sst [smem:[#allocation19_spill]] %s5862_s6  ;;  %s5213_s6 = smov 0  }
   0x8   :  { %5899 = sst [smem:[#allocation20_spill]] %s5863_s7  ;;  %s5217_s7 = smov 0  }
   0x9   :  { %5900 = sst [smem:[#allocation21_spill]] %s5864_s8 }
   0xa   :  { %5901 = sst [smem:[#allocation22_spill]] %s5865_s9 }
   0xb   :  { %5902 = sst [smem:[#allocation23_spill]] %s5866_s10 }
   0xc   :  { %5903 = sst [smem:[#allocation24_spill]] %s5867_s11 }
   0xd   :  { %5904 = sst [smem:[#allocation25_spill]] %s5868_s12 }
   0xe   :  { %5905 = sst [smem:[#allocation26_spill]] %s5869_s13 }
   0xf   :  { %5906 = sst [smem:[#allocation27_spill]] %s5870_s14 }
  0x10   :  { %5907 = sst [smem:[#allocation28_spill]] %s5871_s15 }
  0x11   :  { %5908 = sst [smem:[#allocation29_spill]] %s5872_s16 }
  0x12   :  { %5909 = sst [smem:[#allocation30_spill]] %s5873_s17 }
  0x13   :  { %5910 = sst [smem:[#allocation31_spill]] %s5874_s18 }
  0x14   :  { %5911 = sst [smem:[#allocation32_spill]] %s5875_s19 }
  0x15   :  { %5912 = sst [smem:[#allocation33_spill]] %s5876_s20 }
  0x16   :  { %5913 = sst [smem:[#allocation34_spill]] %s5877_s21 }
  0x17   :  { %5914 = sst [smem:[#allocation35_spill]] %s5878_s22 }
  0x18   :  { %5915 = sst [smem:[#allocation36_spill]] %s5879_s23 }
  0x19   :  { %5916 = sst [smem:[#allocation37_spill]] %s5880_s24 }
  0x1a   :  { %5917 = sst [smem:[#allocation38_spill]] %s5881_s25 }
  0x1b LB: > { %5918 = sst [smem:[#allocation3_spill]] %s5060_s6  ;;  %s44_s3 = sadd.s32 1, %s5060_s6  ;;  %s5068_s7 = sphi %s5217_s7, %s35_s7   ;;  %s5064_s30 = sphi %s5215_s30, %s5984_s30   ;;  %s5060_s6 = sphi %s5213_s6, %s5983_s6   ;;  %s5056_s2 = sphi %s5211_s2, %s5982_s2   ;;  %s5052_s29 = sphi %s5209_s29, %s5981_s29  }
  0x1c   : > { %5919 = sst [smem:[#allocation4_spill]] %s5064_s30  ;;  %s47_s26 = sadd.s32 1, %s5064_s30 }
  0x1d   : > { %5920 = sst [smem:[#allocation5_spill]] %s5068_s7  ;;  %p45_p0 = scmp.ge.s32.totalorder %s44_s3, 2 }
  0x1e   : > { %p4576_p1 = scmp.ge.s32.totalorder %s5068_s7, 1  ;;  %p946_p2 = scmp.lt.s32.totalorder %s5068_s7, 5 }
  0x1f   : > { %s5986_s3 = smov (%p45_p0, %s44_s3), 0  ;;  %s5988_s26 = smov (!%p45_p0, %s47_s26), %s5064_s30 }
  0x20   : > { %5921 = sst [smem:[#allocation6_spill]] %s5986_s3  ;;  %p947_p3 = pnand %p4576_p1, %p946_p2 }
  0x21   : > { %p49_p4 = scmp.ge.s32.totalorder %s5988_s26, 2 }
  0x22   : > { %950 = sbr.rel (%p947_p3) target bundleno = 4426 (0x114a), region = 120 }
  0x23   : > { %s5990_s26 = smov (%p49_p4, %s5988_s26), 0 }
  0x24   : > { %5922 = sst [smem:[#allocation7_spill]] %s5990_s26 }
  0x29   : > { %p1136_p5 = scmp.lt.s32.totalorder %s5056_s2, 1  ;;  %p1165_p6 = scmp.lt.s32.totalorder %s5052_s29, 1 }
  0x2a   : > { %p1269_p7 = scmp.eq.s32.totalorder %s5052_s29, 0  ;;  %p1270_p8 = scmp.eq.s32.totalorder %s5056_s2, 0 }
  0x2b   : > { %s5248_s1 = scalar_select %p1136_p5, %s5056_s2, 1 }
  0x2c   : > { %s5251_s8 = scalar_select %p1165_p6, %s5052_s29, 1 }
  0x2d   : > { %s4733_s30 = sshll.u32 %s5248_s1, 4  ;;  %s5926_s22 = sld [smem:[#allocation15_spill]] }
  0x2e   : > { %s5927_s27 = sld [smem:[#allocation16_spill]]  ;;  %s5928_s18 = sld [smem:[#allocation18_spill]] }
  0x2f   : > { %s4924_s7 = smul.u32 12, %s5251_s8  ;;  %s4585_s25 = sshll.u32 %s5251_s8, 2 }
  0x30   : > { %s4586_s23 = sshll.u32 %s5248_s1, 3  ;;  %s4588_s20 = sshll.u32 %s5248_s1, 1 }
  0x31   : > { %s1187_s19 = sadd.s32 %s4586_s23, %s4585_s25  ;;  %s5931_s11 = sld [smem:[#allocation24_spill]] }
  0x32   : > { %s5932_s12 = sld [smem:[#allocation25_spill]]  ;;  %s5933_s13 = sld [smem:[#allocation26_spill]] }
  0x33   : > { %s5269_s21 = scalar_lea.vmem %s5926_s22, %s4733_s30  ;;  %s4925_s22 = smul.u32 24, %s5248_s1 }
  0x34   : > { %s5274_s4 = scalar_lea.vmem %s5927_s27, %s4733_s30  ;;  %s5279_s26 = scalar_lea.vmem %s5928_s18, %s4733_s30 }
  0x35   : > { %5929 = sst [smem:[#allocation8_spill]] %s5279_s26  ;;  %s1169_s24 = sadd.s32 %s4925_s22, %s4924_s7 }
  0x36   : > { %s4587_s27 = sshll.u32 %s1187_s19, 2  ;;  %s4583_s9 = sshll.u32 %s1169_s24, 2 }
  0x37   : > { %s4584_s28 = sshll.u32 %s1169_s24, 3  ;;  %s5293_s3 = scalar_lea.vmem %s5931_s11, %s4583_s9 }
  0x38   : > { %s5298_s6 = scalar_lea.vmem %s5932_s12, %s4584_s28  ;;  %s5303_s25 = scalar_lea.vmem %s5933_s13, %s4587_s27 }
  0x39   : > { %5934 = sst [smem:[#allocation9_spill]] %s5303_s25  ;;  %s5306_s23 = sadd.s32 %s4588_s20, %s5251_s8 }
  0x3a   : > { %s4591_s18 = sshll.u32 %s5251_s8, 6  ;;  %s4592_s30 = sshll.u32 %s5248_s1, 7 }
  0x3b   : > { %s4594_s5 = sshll.u32 %s5251_s8, 4  ;;  %s1217_s0 = sadd.s32 %s4592_s30, %s4591_s18 }
  0x3c   : > { %s4595_s7 = sshll.u32 %s5248_s1, 5  ;;  %s4593_s22 = sshll.u32 %s1217_s0, 2 }
  0x3d   : > { %s1226_s11 = sadd.s32 %s4595_s7, %s4594_s5  ;;  %s5938_s17 = sld [smem:[#allocation30_spill]] }
  0x3e   : > { %s5940_s13 = sld [smem:[#allocation31_spill]]  ;;  %s5942_s16 = sld [smem:[#allocation32_spill]] }
  0x3f   : > { %s5944_s30 = sld [smem:[#allocation33_spill]]  ;;  %s5945_s14 = sld [smem:[#allocation34_spill]] }
  0x40   : > { %s5949_s8 = sld [smem:[#allocation38_spill]]  ;;  %p1271_p9 = pnand %p1270_p8, %p1269_p7 }
  0x41   : > { %vm1288_vm0 = vcmask (!%p1271_p9), 261120   ;;  %v1275_v5 = vld [vmem:[%s5269_s21] sm:$0xff] (!%p1271_p9)  ;;  %v1276_v7 = vld [vmem:[%s5269_s21 + $0x8] sm:$0xff] (!%p1271_p9)  ;;  %vm1381_vm1 = vcmask (!%p1271_p9), 130048  }
  0x42   : > { %4794 = vmatprep.mubr.msk.f32.mxu0 (!%p1271_p9), %vm1288_vm0, %v1275_v5  ;;  %v1464_v20 = vld [vmem:[%s5274_s4 + $0x8] sm:$0xff] (!%p1271_p9)  ;;  %v1463_v23 = vld [vmem:[%s5274_s4] sm:$0xff] (!%p1271_p9) }
  0x43   : > { %s5327_s24 = scalar_lea.vmem %s5938_s17, %s4593_s22 }
  0x44   : > { %5939 = sst [smem:[#allocation10_spill]] %s5327_s24  ;;  %s5332_s26 = scalar_lea.vmem %s5940_s13, %s1226_s11 }
  0x45   : > { %5941 = sst [smem:[#allocation11_spill]] %s5332_s26  ;;  %s5337_s15 = scalar_lea.vmem %s5942_s16, %s4593_s22 }
  0x46   : > { %5943 = sst [smem:[#allocation12_spill]] %s5337_s15  ;;  %s1243_s0 = scalar_lea.vmem %s5944_s30, %s5306_s23 }
  0x47   : > { %s1250_s12 = scalar_lea.vmem %s5945_s14, %s5306_s23  ;;  %s5946_s24 = sld [smem:[#allocation35_spill]] }
  0x48   : > { %s5947_s13 = sld [smem:[#allocation36_spill]]  ;;  %s5948_s16 = sld [smem:[#allocation37_spill]] }
  0x49   : > { %s5362_s18 = scalar_lea.vmem %s5949_s8, %s4588_s20  ;;  %1274 = sbr.rel (%p1271_p9) target bundleno = 530 (0x212), region = 124 }
  0x4a   : > { %s5951_s11 = sld [smem:[#allocation22_spill]] (!%p1271_p9)  ;;  %s5952_s8 = sld [smem:[#allocation21_spill]] (!%p1271_p9) }
  0x4b   : > { %s5953_s30 = sld [smem:[#allocation23_spill]] (!%p1271_p9) }
  0x4d   : > { %s1257_s25 = scalar_lea.vmem %s5946_s24, %s5306_s23  ;;  %s5950_s24 = sld [smem:[#allocation20_spill]] (!%p1271_p9) }
  0x4e   : > { %s1260_s9 = scalar_lea.vmem %s5947_s13, %s5248_s1  ;;  %s1263_s22 = scalar_lea.vmem %s5948_s16, %s5248_s1 }
  0x50   : > { %v1372_v8 = vld [vmem:[%s5951_s11] sm:$0xff]  ;;  %v1373_v9 = vld [vmem:[%s5951_s11 + $0x8] sm:$0xff] }
  0x51   : > { %v4896_v10 = vpack.c.bf16 %v1373_v9, %v1372_v8  ;;  %v4603_v11 = vld [vmem:[%s5952_s8] ss:$0 sm:$0xff] }
  0x52   : > { %v4606_v18 = vld [vmem:[%s5953_s30] ss:$0 sm:$0xff] }
  0x53   : > { %v1277_v0 = vld [vmem:[%s5950_s24] sm:$0xff]  ;;  %v1278_v1 = vld [vmem:[%s5950_s24 + $0x8] sm:$0xff]  ;;  %v1279_v2 = vld [vmem:[%s5950_s24 + $0x10] sm:$0xff]  ;;  %4897 = vmatprep.subr.bf16.mxu1 %v4896_v10 }
  0x54   : > { %v4888_v3 = vpack.c.bf16 %v1278_v1, %v1277_v0  ;;  %v1280_v4 = vld [vmem:[%s5950_s24 + $0x18] sm:$0xff]  ;;  %4899 = vmatpush3.bf16.msra.mxu1 %v4896_v10 }
  0x55   : > { %v4892_v6 = vpack.c.bf16 %v1280_v4, %v1279_v2 }
  0x56   : > { %4889 = vmatprep.subr.bf16.mxu0 %v4888_v3 }
  0x57   : > { %4891 = vmatpush3.bf16.msra.mxu0 %v4888_v3 }
  0x58   : > { %4893 = vmatprep.subr.bf16.mxu0 %v4892_v6 }
  0x5b   : > { %4895 = vmatpush3.bf16.msra.mxu0 %v4892_v6 }
  0x5e   : > { %4795 = vmatmul.mubr.msk.f32.vlgmr.msra.gmra.mrb[0].mxu0 %vm1288_vm0, %v1276_v7 }
 0x131   : > { %v4796_v12 = vpop.f32.mrb[0].mxu0 }
 0x132   : > { %v1367_v13 = vadd.f32 %v4796_v12, %v4603_v11  ;;  %v1361_v14 = vpop.f32.mrb[1].mxu0 }
 0x133   : > { %v1362_v15 = vadd.f32 %v4603_v11, %v1361_v14 }
 0x134   : > { %v1371_v17 = vmax.f32 %v1367_v13, 0.0 }
 0x135   : > { %v1370_v16 = vmax.f32 %v1362_v15, 0.0 }
 0x137   : > { %4801 = vmatprep.mubr.msk.f32.mxu1 %vm1381_vm1, %v1370_v16 }
 0x138   : > { %4802 = vmatmul.mubr.msk.f32.vlgmr.msra.gmra.mrb[0].mxu1 %vm1381_vm1, %v1371_v17 }
 0x20b   : > { %v4803_v19 = vpop.f32.mrb[0].mxu1 }
 0x20c   : > { %v1460_v21 = vadd.f32 %v4803_v19, %v4606_v18  ;;  %v1454_v22 = vpop.f32.mrb[1].mxu1 }
 0x20d   : > { %v1455_v24 = vadd.f32 %v4606_v18, %v1454_v22 }
 0x20e   : > { %v1466_v25 = vadd.f32 %v1464_v20, %v1460_v21 }
 0x20f   : > { %v1465_v26 = vadd.f32 %v1463_v23, %v1455_v24 }
 0x210   : > { %1468 = vst.msk [vmem:[#allocation2 + $0x8] sm:$0xff] %vm1288_vm0, %v1466_v25 }
 0x211   : > { %1467 = vst.msk [vmem:[#allocation2] sm:$0xff] %vm1288_vm0, %v1465_v26 }
 0x212 PF: > { %p1469_p10 = scmp.ne.s32.totalorder %s5056_s2, 0 }
 0x214   : > { %p1470_p11 = pnand %p1469_p10, %p1269_p7 }
 0x215   : > { %v1474_v27 = vld [vmem:[%s5269_s21] sm:$0xff] (!%p1470_p11)  ;;  %vm1480_vm2 = vcmask (!%p1470_p11), 261120   ;;  %v1475_v29 = vld [vmem:[%s5269_s21 + $0x8] sm:$0xff] (!%p1470_p11) }
 0x216   : > { %1473 = sbr.rel (%p1470_p11) target bundleno = 541 (0x21d), region = 128  ;;  %v1476_v28 = vld [vmem:[%s5274_s4] sm:$0xff] (!%p1470_p11)  ;;  %v1477_v31 = vld [vmem:[%s5274_s4 + $0x8] sm:$0xff] (!%p1470_p11) }
 0x217   : > { %v1478_v30 = vadd.f32 (!%p1470_p11), %v1476_v28, %v1474_v27  ;;  %v1479_v32 = vadd.f32 (!%p1470_p11), %v1477_v31, %v1475_v29 }
 0x219   : > { %1481 = vst.msk [vmem:[#allocation2] sm:$0xff] (!%p1470_p11), %vm1480_vm2, %v1478_v30  ;;  %1482 = vst.msk [vmem:[#allocation2 + $0x8] sm:$0xff] (!%p1470_p11), %vm1480_vm2, %v1479_v32 }
 0x21d PF: > { %vm1619_vm3 = vcmask 261120   ;;  %v4977_v36 = vld [vmem:[%s5293_s3] sm:$0xff]   ;;  %v5070_v37 = vmov 0   ;;  %v1518_v40 = vld [vmem:[%s5298_s6 + $0x8] sm:$0xff]  ;;  %s5954_s4 = sld [smem:[#allocation14_spill]]  ;;  %v4979_v43 = vld [vmem:[%s5293_s3 + $0x10] sm:$0xff]  }
 0x21e   : > { %4975 = vset.pattern.permute.xlu0 %v5070_v37  ;;  %4976 = vset.pattern.permute.xlu1 %v5070_v37  ;;  %v1517_v39 = vld [vmem:[%s5298_s6] sm:$0xff]  ;;  %v4978_v41 = vld [vmem:[%s5293_s3 + $0x8] sm:$0xff]   ;;  %v1519_v44 = vld [vmem:[%s5298_s6 + $0x10] sm:$0xff]  ;;  %s5956_s26 = sld [smem:[#allocation8_spill]]  ;;  %vm1768_vm4 = vcmask 64512   ;;  %s5957_s15 = sld [smem:[#allocation17_spill]] }
 0x21f   : > { %4806 = vmatprep.mubr.msk.bf16.mxu0 %vm1619_vm3, %v4977_v36  ;;  %1531 = vperm.xlu0 %4975, %v1517_v39   ;;  %v1520_v45 = vld [vmem:[%s5298_s6 + $0x18] sm:$0xff]  ;;  %v1521_v46 = vld [vmem:[%s5298_s6 + $0x20] sm:$0xff]  ;;  %v1522_v47 = vld [vmem:[%s5298_s6 + $0x28] sm:$0xff]  ;;  %v5071_v31 = vmov -1e+30   ;;  %vm2189_vm7 = vcmask 130048  }
 0x220   : > { %v5407_v33 = vld [vmem:[#allocation2] sm:$0xff]  ;;  %v5409_v34 = vld [vmem:[#allocation2 + $0x8] sm:$0xff]  ;;  %1536 = vperm.xlu1 %4976, %v1518_v40   ;;  %v4980_v48 = vld [vmem:[%s5293_s3 + $0x18] sm:$0xff]   ;;  %vm5073_vm8 = vmmov 0   ;;  %s5962_s13 = sld [smem:[#allocation27_spill]]  ;;  %s5964_s8 = sld [smem:[#allocation13_spill]] }
 0x221   : > { %v1516_v35 = vpack.c.bf16 %v5409_v34, %v5407_v33  ;;  %v1523_v49 = vld [vmem:[%s5298_s6 + $0x30] sm:$0xff]  ;;  %v1524_v50 = vld [vmem:[%s5298_s6 + $0x38] sm:$0xff]  ;;  %v4981_v14 = vld [vmem:[%s5293_s3 + $0x20] sm:$0xff]   ;;  %s5966_s21 = sld [smem:[#allocation19_spill]]  ;;  %p4726_p12 = scmp.ne.s32.totalorder %s5052_s29, 1 }
 0x222   : > { %v4982_v15 = vld [vmem:[%s5293_s3 + $0x28] sm:$0xff]   ;;  %vm5503_vm9 = vmpackc.low %vm2189_vm7, %vm2189_vm7  ;;  %s5969_s3 = sld [smem:[#allocation28_spill]]  ;;  %s5973_s28 = sld [smem:[#allocation12_spill]]  ;;  %vm5076_vm11 = vmmov (!%p4726_p12), 0   ;;  %vm4130_vm13 = vcmask (!%p4726_p12), 123904   ;;  %vm4215_vm14 = vcmask (!%p4726_p12), 254976  }
 0x223   : > { %4923 = vmatprep.subr.msk.bf16.mxu0 %vm1619_vm3, %v1516_v35  ;;  %v1639_v38 = vsel %vm1619_vm3, %v1516_v35, 0  ;;  %s5955_s5 = scalar_lea.vmem %s5954_s4, %s5248_s1  ;;  %s5968_s4 = sld [smem:[#allocation10_spill]]  ;;  %vm4918_vm10 = vmpackc.low (!%p4726_p12), %vm1619_vm3, %vm1619_vm3 }
 0x224   : > { %4805 = vmatpush3.bf16.xpose.msra.mxu0 %v1639_v38  ;;  %v4622_v42 = vld [vmem:[%s5955_s5] ss:$0 sm:$0xff]  ;;  %1541 = vperm.xlu1 %4976, %v1519_v44   ;;  %v1489_v13 = vld [vmem:[%s5956_s26 + $0x8] sm:$0xff]  ;;  %s5958_s20 = scalar_lea.vmem %s5957_s15, %s5248_s1 }
 0x225   : > { %1729 = vperm.xlu0 %4975, %v4622_v42   ;;  %v1488_v12 = vld [vmem:[%s5956_s26] sm:$0xff] }
 0x226   : > { %v5457_v29 = vld [vmem:[%s5958_s20] ss:$0 sm:$0xff]  ;;  %s5963_s27 = scalar_lea.vmem %s5962_s13, %s5306_s23  ;;  %s5965_s14 = scalar_lea.vmem %s5964_s8, %s5248_s1 }
 0x227   : > { %s5967_s2 = scalar_lea.vmem %s5966_s21, %s5248_s1  ;;  %s5974_s13 = sld [smem:[#allocation11_spill]] }
 0x228   : > { %1551 = vperm.xlu1 %4976, %v1521_v46   ;;  %s5970_s7 = scalar_lea.vmem %s5969_s3, %s5306_s23 }
 0x229   : > { %1546 = vperm.xlu0 %4975, %v1520_v45  }
 0x22b   : > { %4807 = vmatmul.mubr.msk.bf16.vlgmr.msra.gmra.mrb[0].mxu0 %vm1619_vm3, %v4978_v41 }
 0x22c   : > { %4810 = vmatprep.mubr.msk.bf16.mxu0 %vm1619_vm3, %v4979_v43  ;;  %1561 = vperm.xlu1 %4976, %v1523_v49  }
 0x22d   : > { %1556 = vperm.xlu0 %4975, %v1522_v47  }
 0x231   : > { %1566 = vperm.xlu0 %4975, %v1524_v50  }
 0x233   : > { %4811 = vmatmul.mubr.msk.bf16.gmra.mrb[4].mxu0 %vm1619_vm3, %v4980_v48 }
 0x234   : > { %4814 = vmatprep.mubr.msk.bf16.mxu0 %vm1619_vm3, %v4981_v14 }
 0x23b   : > { %4815 = vmatmul.mubr.msk.bf16.gmra.mrb[8].mxu0 %vm1619_vm3, %v4982_v15 }
 0x29e   : > { %v1532_v51 = vpop.permute.xlu0 %1531 }
 0x29f   : > { %v1537_v52 = vpop.permute.xlu1 %1536 }
 0x2a3   : > { %v1542_v58 = vpop.permute.xlu1 %1541 }
 0x2a4   : > { %v1730_v53 = vpop.permute.xlu0 %1729 }
 0x2a7   : > { %v1552_v2 = vpop.permute.xlu1 %1551 }
 0x2a8   : > { %v1547_v62 = vpop.permute.xlu0 %1546 }
 0x2ab   : > { %v1562_v16 = vpop.permute.xlu1 %1561 }
 0x2ac   : > { %v1557_v6 = vpop.permute.xlu0 %1556 }
 0x2b0   : > { %v1567_v17 = vpop.permute.xlu0 %1566 }
 0x2fe   : > { %v4808_v54 = vpop.f32.mrb[0].mxu0 }
 0x2ff   : > { %v1675_v55 = vpop.f32.mrb[1].mxu0  ;;  %v1684_v0 = vadd.f32 %v4808_v54, %v1542_v58 }
 0x300   : > { %v1676_v56 = vadd.f32 %v1675_v55, %v1532_v51  ;;  %v4809_v57 = vpop.f32.mrb[2].mxu0 }
 0x301   : > { %v1678_v59 = vpop.f32.mrb[3].mxu0  ;;  %v1734_v7 = vmul.f32 %v1730_v53, %v1684_v0  ;;  %v1687_v9 = vadd.f32 %v4809_v57, %v1547_v62 }
 0x302   : > { %v1732_v60 = vmul.f32 %v1730_v53, %v1676_v56  ;;  %v1679_v61 = vadd.f32 %v1678_v59, %v1537_v52 }
 0x303   : > { %v1735_v11 = vmul.f32 %v1730_v53, %v1687_v9 }
 0x304   : > { %v1733_v63 = vmul.f32 %v1730_v53, %v1679_v61  ;;  %1736 = vxpose.xlu1.b32.start.end [1/1] (short) (narrow) %v1732_v60, 16  ;;  %v1525_v61 = vld [vmem:[%s5298_s6 + $0x40] sm:$0xff] }
 0x306   : > { %v4812_v1 = vpop.f32.mrb[4].mxu0  ;;  %1850 = vxpose.xlu0.b32.start.end [1/1] (short) (narrow) %v1733_v63, 16 }
 0x307   : > { %v1691_v3 = vpop.f32.mrb[5].mxu0  ;;  %v1700_v21 = vadd.f32 %v4812_v1, %v1562_v16 }
 0x308   : > { %v1692_v4 = vadd.f32 %v1691_v3, %v1552_v2  ;;  %v4813_v5 = vpop.f32.mrb[6].mxu0 }
 0x309   : > { %v1694_v8 = vpop.f32.mrb[7].mxu0  ;;  %v1703_v23 = vadd.f32 %v4813_v5, %v1567_v17 }
 0x30a   : > { %v1695_v10 = vadd.f32 %v1694_v8, %v1557_v6  ;;  %4818 = vmatprep.subr.mxu1 %v1692_v4 }
 0x30b   : > { %4819 = vmatpush3.msra.mxu1 %v1692_v4  ;;  %1963 = vxpose.xlu0.b32.start.end [1/1] (short) (narrow) %v1734_v7, 16 }
 0x30c   : > { %4823 = vmatprep.subr.mxu1 %v1695_v10 }
 0x30e   : > { %v5473_v62 = vpop.f32.mrb[8].mxu0 }
 0x30f   : > { %v5475_v63 = vpop.f32.mrb[9].mxu0 }
 0x310   : > { %2076 = vxpose.xlu0.b32.start.end [1/1] (short) (narrow) %v1735_v11, 16 }
 0x326   : > { %1491 = vperm.xlu1 %4976, %v1488_v12  }
 0x33d   : > { %1494 = vperm.xlu0 %4975, %v1489_v13  }
 0x384   : > { %v1752_v18 = vpop.trf.xlu1 }
 0x385   : > { %4820 = vmatprep.mubr.msk.f32.mxu1 %vm1768_vm4, %v1752_v18 }
 0x386   : > { %v1866_v19 = vpop.trf.xlu0 }
 0x388   : > { %v1753_v20 = vpop.trf.xlu1 }
 0x389   : > { %4821 = vmatmul.mubr.msk.f32.vlgmr.msra.gmra.mrb[0].mxu1 %vm1768_vm4, %v1753_v20 }
 0x38a   : > { %4824 = vmatpush3.msra.mxu1 %v1695_v10  ;;  %v1867_v22 = vpop.trf.xlu0  ;;  %4825 = vmatprep.mubr.msk.f32.mxu1 %vm1768_vm4, %v1866_v19 }
 0x38b   : > { %4828 = vmatprep.subr.mxu1 %v1700_v21 }
 0x38d   : > { %4826 = vmatmul.mubr.msk.f32.vlgmr.msra.gmra.mrb[2].mxu1 %vm1768_vm4, %v1867_v22 }
 0x38e   : > { %4829 = vmatpush3.msra.mxu1 %v1700_v21  ;;  %v1979_v24 = vpop.trf.xlu0 }
 0x38f   : > { %4833 = vmatprep.subr.mxu1 %v1703_v23  ;;  %4830 = vmatprep.mubr.msk.f32.mxu1 %vm1768_vm4, %v1979_v24 }
 0x392   : > { %v1980_v25 = vpop.trf.xlu0 }
 0x393   : > { %4831 = vmatmul.mubr.msk.f32.vlgmr.msra.gmra.mrb[4].mxu1 %vm1768_vm4, %v1980_v25 }
 0x394   : > { %4834 = vmatpush3.msra.mxu1 %v1703_v23 }
 0x396   : > { %v2092_v26 = vpop.trf.xlu0 }
 0x397   : > { %4835 = vmatprep.mubr.msk.f32.mxu1 %vm1768_vm4, %v2092_v26 }
 0x39a   : > { %v2093_v27 = vpop.trf.xlu0 }
 0x39b   : > { %4836 = vmatmul.mubr.msk.f32.vlgmr.msra.gmra.mrb[6].mxu1 %vm1768_vm4, %v2093_v27 }
 0x3a5   : > { %v1492_v30 = vpop.permute.xlu1 %1491 }
 0x3a6   : > { %vm1500_vm6 = vcmp.eq.s32.totalorder %v1492_v30, %v5457_v29 }
 0x3a7   : > { %v1502_v36 = vsel %vm1500_vm6, 0.0, %v5071_v31 }
 0x3bc   : > { %v1495_v28 = vpop.permute.xlu0 %1494 }
 0x3bd   : > { %vm1501_vm5 = vcmp.eq.s32.totalorder %v1495_v28, %v5457_v29 }
 0x3be   : > { %v1503_v32 = vsel %vm1501_vm5, 0.0, %v5071_v31 }
 0x45c   : > { %v4822_v35 = vpop.f32.mrb[0].mxu1 }
 0x45d   : > { %v1847_v38 = vadd.f32 %v4822_v35, %v1503_v32  ;;  %v1841_v39 = vpop.f32.mrb[1].mxu1 }
 0x45e   : > { %v1842_v40 = vadd.f32 %v1841_v39, %v1502_v36  ;;  %v1527_v39 = vld [vmem:[%s5298_s6 + $0x50] sm:$0xff] }
 0x45f   : > { %v2193_v41 = vsel %vm2189_vm7, %v1847_v38, -inf }
 0x460   : > { %2194 = vmax.xlane.f32.xlu0 %v2193_v41  ;;  %v4827_v42 = vpop.f32.mrb[2].mxu1  ;;  %v2190_v43 = vsel %vm2189_vm7, %v1842_v40, -inf  ;;  %v1526_v41 = vld [vmem:[%s5298_s6 + $0x48] sm:$0xff] }
 0x461   : > { %v1960_v44 = vadd.f32 %v4827_v42, %v1503_v32  ;;  %v1954_v45 = vpop.f32.mrb[3].mxu1  ;;  %2191 = vmax.xlane.f32.xlu1 %v2190_v43  ;;  %v5074_v42 = vmov 0.0   ;;  %v5496_v43 = vpop.f32.mrb[10].mxu0 }
 0x462   : > { %v1955_v47 = vadd.f32 %v1954_v45, %v1502_v36  ;;  %4842 = vmatprep.mubr.msk.f32.mxu1 %vm5073_vm8, %v5074_v42  ;;  %4856 = vmatprep.mubr.msk.f32.mxu0 %vm5073_vm8, %v5074_v42 }
 0x463   : > { %v2199_v46 = vsel %vm2189_vm7, %v1960_v44, -inf }
 0x464   : > { %v2196_v52 = vsel %vm2189_vm7, %v1955_v47, -inf }
 0x465   : > { %2200 = vmax.xlane.f32.xlu1 %v2199_v46 }
 0x466   : > { %v4832_v48 = vpop.f32.mrb[4].mxu1 }
 0x467   : > { %v2073_v49 = vadd.f32 %v4832_v48, %v1503_v32  ;;  %v2067_v50 = vpop.f32.mrb[5].mxu1 }
 0x468   : > { %v2068_v51 = vadd.f32 %v2067_v50, %v1502_v36  ;;  %v1528_v50 = vld [vmem:[%s5298_s6 + $0x58] sm:$0xff]  ;;  %s5961_s6 = sld [smem:[#allocation9_spill]] }
 0x469   : > { %2197 = vmax.xlane.f32.xlu1 %v2196_v52  ;;  %v2205_v53 = vsel %vm2189_vm7, %v2073_v49, -inf }
 0x46a   : > { %2206 = vmax.xlane.f32.xlu0 %v2205_v53  ;;  %v2202_v54 = vsel %vm2189_vm7, %v2068_v51, -inf }
 0x46d   : > { %2203 = vmax.xlane.f32.xlu1 %v2202_v54 }
 0x46e   : > { %v4837_v55 = vpop.f32.mrb[6].mxu1 }
 0x46f   : > { %v2186_v56 = vadd.f32 %v4837_v55, %v1503_v32  ;;  %v2180_v57 = vpop.f32.mrb[7].mxu1 }
 0x470   : > { %v5467_v58 = vadd.f32 %v2180_v57, %v1502_v36 }
 0x471   : > { %v2211_v59 = vsel %vm2189_vm7, %v2186_v56, -inf }
 0x472   : > { %2212 = vmax.xlane.f32.xlu0 %v2211_v59  ;;  %v2208_v60 = vsel %vm2189_vm7, %v5467_v58, -inf }
 0x473   : > { %2209 = vmax.xlane.f32.xlu1 %v2208_v60 }
 0x484   : > { %1571 = vperm.xlu1 %4976, %v1525_v61  }
 0x4ed   : > { %v2195_v0 = vpop.xlane.xlu0 %2194 }
 0x4ee   : > { %v2215_v1 = vsub.f32 %v1847_v38, %v2195_v0  ;;  %v2192_v2 = vpop.xlane.xlu1 %2191 }
 0x4ef   : > { %v2214_v3 = vsub.f32 %v1842_v40, %v2192_v2  ;;  %v5072_v40 = vmov 0.0|0.0  }
 0x4f0   : > { %v2224_v4 = vmul.f32 1.442695, %v2215_v1  ;;  %4900 = vmatprep.subr.bf16.mxu1 %v5072_v40  ;;  %4908 = vmatprep.subr.bf16.mxu0 %v5072_v40 }
 0x4f1   : > { %v2222_v5 = vmul.f32 1.442695, %v2214_v3 }
 0x4f2   : > { %4985 = vpow2.f32 %v2224_v4  ;;  %v2201_v6 = vpop.xlane.xlu1 %2200 }
 0x4f3   : > { %4987 = vpow2.f32 %v2222_v5  ;;  %v2217_v7 = vsub.f32 %v1960_v44, %v2201_v6  ;;  %v1710_v44 = vpop.f32.mrb[11].mxu0 }
 0x4f5   : > { %v2228_v8 = vmul.f32 1.442695, %v2217_v7 }
 0x4f6   : > { %v2198_v9 = vpop.xlane.xlu1 %2197 }
 0x4f7   : > { %4989 = vpow2.f32 %v2228_v8  ;;  %v2216_v10 = vsub.f32 %v1955_v47, %v2198_v9  ;;  %v2207_v11 = vpop.xlane.xlu0 %2206 }
 0x4f8   : > { %v2219_v12 = vsub.f32 %v2073_v49, %v2207_v11 }
 0x4f9   : > { %v2226_v13 = vmul.f32 1.442695, %v2216_v10 }
 0x4fa   : > { %v2232_v14 = vmul.f32 1.442695, %v2219_v12  ;;  %v2204_v15 = vpop.xlane.xlu1 %2203 }
 0x4fb   : > { %4991 = vpow2.f32 %v2226_v13  ;;  %v2218_v16 = vsub.f32 %v2068_v51, %v2204_v15 }
 0x4fc   : > { %v4986_v17 = vpop.eup %4985  ;;  %4993 = vpow2.f32 %v2232_v14 }
 0x4fd   : > { %v4988_v18 = vpop.eup %4987  ;;  %v2230_v19 = vmul.f32 1.442695, %v2218_v16  ;;  %v2241_v20 = vsel %vm2189_vm7, %v4986_v17, 0.0 }
 0x4fe   : > { %2242 = vadd.xlane.f32.xlu0 %v2241_v20  ;;  %v2238_v21 = vsel %vm2189_vm7, %v4988_v18, 0.0 }
 0x4ff   : > { %4995 = vpow2.f32 %v2230_v19  ;;  %v2213_v22 = vpop.xlane.xlu0 %2212  ;;  %2239 = vadd.xlane.f32.xlu1 %v2238_v21 }
 0x500   : > { %v2221_v23 = vsub.f32 %v2186_v56, %v2213_v22  ;;  %v2210_v45 = vpop.xlane.xlu1 %2209 }
 0x501   : > { %v4990_v24 = vpop.eup %4989  ;;  %v2220_v46 = vsub.f32 %v5467_v58, %v2210_v45 }
 0x502   : > { %v2236_v25 = vmul.f32 1.442695, %v2221_v23  ;;  %v2247_v26 = vsel %vm2189_vm7, %v4990_v24, 0.0 }
 0x503   : > { %2248 = vadd.xlane.f32.xlu0 %v2247_v26  ;;  %v2234_v47 = vmul.f32 1.442695, %v2220_v46 }
 0x504   : > { %4997 = vpow2.f32 %v2236_v25  ;;  %v1572_v51 = vpop.permute.xlu1 %1571  ;;  %v4984_v25 = vld [vmem:[%s5961_s6 + $0x8] sm:$0xff]  }
 0x505   : > { %v4992_v27 = vpop.eup %4991  ;;  %4999 = vpow2.f32 %v2234_v47  ;;  %v1708_v7 = vadd.f32 %v5475_v63, %v1572_v51 }
 0x506   : > { %v5480_v28 = vpop.eup %4993  ;;  %v2244_v30 = vsel %vm2189_vm7, %v4992_v27, 0.0 }
 0x507   : > { %2245 = vadd.xlane.f32.xlu1 %v2244_v30  ;;  %v2253_v31 = vsel %vm2189_vm7, %v5480_v28, 0.0 }
 0x508   : > { %2254 = vadd.xlane.f32.xlu0 %v2253_v31 }
 0x509   : > { %v4996_v32 = vpop.eup %4995 }
 0x50a   : > { %v2250_v35 = vsel %vm2189_vm7, %v4996_v32, 0.0 }
 0x50b   : > { %2251 = vadd.xlane.f32.xlu1 %v2250_v35 }
 0x50e   : > { %v5486_v36 = vpop.eup %4997 }
 0x50f   : > { %v2259_v38 = vsel %vm2189_vm7, %v5486_v36, 0.0  ;;  %v5000_v48 = vpop.eup %4999 }
 0x510   : > { %2260 = vadd.xlane.f32.xlu0 %v2259_v38  ;;  %v2256_v49 = vsel %vm2189_vm7, %v5000_v48, 0.0 }
 0x51c   : > { %1581 = vperm.xlu1 %4976, %v1527_v39  }
 0x526   : > { %1576 = vperm.xlu0 %4975, %v1526_v41   ;;  %v4643_v41 = vld [vmem:[%s5963_s27] ss:$0 sm:$0xff] }
 0x540   : > { %2257 = vadd.xlane.f32.xlu1 %v2256_v49 }
 0x551   : > { %1586 = vperm.xlu1 %4976, %v1528_v50  }
 0x58b   : > { %v2243_v52 = vpop.xlane.xlu0 %2242 }
 0x58c   : > { %5001 = vrcp.f32 %v2243_v52  ;;  %v2240_v53 = vpop.xlane.xlu1 %2239  ;;  %v5551_v52 = vld [vmem:[%s5965_s14] ss:$0 sm:$0xff] }
 0x58d   : > { %5003 = vrcp.f32 %v2240_v53 }
 0x590   : > { %v2249_v54 = vpop.xlane.xlu0 %2248 }
 0x591   : > { %5005 = vrcp.f32 %v2249_v54 }
 0x594   : > { %v2246_v55 = vpop.xlane.xlu1 %2245 }
 0x595   : > { %5007 = vrcp.f32 %v2246_v55  ;;  %v2255_v56 = vpop.xlane.xlu0 %2254 }
 0x596   : > { %v5002_v57 = vpop.eup %5001  ;;  %5009 = vrcp.f32 %v2255_v56 }
 0x597   : > { %v5004_v58 = vpop.eup %5003  ;;  %v2265_v59 = vmul.f32 %v5002_v57, %v4986_v17 }
 0x598   : > { %v2263_v60 = vmul.f32 %v5004_v58, %v4988_v18  ;;  %v2252_v61 = vpop.xlane.xlu1 %2251 }
 0x599   : > { %5011 = vrcp.f32 %v2252_v61 }
 0x59a   : > { %v4901_v1 = vpack.c.bf16 %v2265_v59, %v2263_v60 }
 0x59b   : > { %v5006_v2 = vpop.eup %5005 }
 0x59c   : > { %4903 = vmatpush3.bf16.xpose.msk.msra.mxu1 %vm5503_vm9, %v4901_v1  ;;  %v2269_v4 = vmul.f32 %v5006_v2, %v4990_v24  ;;  %v1582_v15 = vpop.permute.xlu1 %1581  ;;  %v4983_v24 = vld [vmem:[%s5961_s6] sm:$0xff]   ;;  %s5971_s6 = sld [smem:[#allocation29_spill]] }
 0x59d   : > { %4904 = vmatprep.subr.bf16.mxu1 %v5072_v40  ;;  %v2261_v8 = vpop.xlane.xlu0 %2260  ;;  %v1716_v16 = vadd.f32 %v5473_v62, %v1582_v15  ;;  %v2768_v15 = vld [vmem:[%s5968_s4 + $0x48] sm:$0xff] }
 0x59e   : > { %5013 = vrcp.f32 %v2261_v8 }
 0x59f   : > { %v5008_v3 = vpop.eup %5007 }
 0x5a0   : > { %v2267_v5 = vmul.f32 %v5008_v3, %v4992_v27  ;;  %v5010_v6 = vpop.eup %5009 }
 0x5a1   : > { %v2273_v11 = vmul.f32 %v5010_v6, %v5480_v28 }
 0x5a2   : > { %v4905_v9 = vpack.c.bf16 %v2269_v4, %v2267_v5  ;;  %s5972_s19 = scalar_lea.vmem %s5971_s6, %s5306_s23 }
 0x5a3   : > { %v5012_v10 = vpop.eup %5011  ;;  %4843 = vmatmul.mubr.msk.f32.vlgmr.msra.gmra.mrb[8].mxu1 %vm2189_vm7, %v1708_v7 }
 0x5a4   : > { %v2271_v12 = vmul.f32 %v5012_v10, %v4996_v32  ;;  %4907 = vmatpush3.bf16.xpose.msk.msra.mxu1 %vm5503_vm9, %v4905_v9  ;;  %4849 = vmatprep.mubr.msk.f32.mxu1 %vm5073_vm8, %v5074_v42 }
 0x5a5   : > { %4912 = vmatprep.subr.bf16.mxu1 %v5072_v40  ;;  %v1577_v13 = vpop.permute.xlu0 %1576 }
 0x5a6   : > { %v4909_v14 = vpack.c.bf16 %v2273_v11, %v2271_v12  ;;  %v1711_v63 = vadd.f32 %v1710_v44, %v1577_v13  ;;  %v2759_v11 = vld [vmem:[%s5968_s4] sm:$0xff]  ;;  %v2760_v13 = vld [vmem:[%s5968_s4 + $0x8] sm:$0xff] }
 0x5a7   : > { %v2767_v12 = vld [vmem:[%s5968_s4 + $0x40] sm:$0xff] }
 0x5a8   : > { %4911 = vmatpush3.bf16.xpose.msk.msra.mxu0 %vm5503_vm9, %v4909_v14  ;;  %v5014_v18 = vpop.eup %5013 }
 0x5a9   : > { %4866 = vmatprep.subr.bf16.mxu0 %v5074_v42  ;;  %v2277_v20 = vmul.f32 %v5014_v18, %v5486_v36  ;;  %v4654_v18 = vcombine.high %v2760_v13, %v2768_v15 }
 0x5ab   : > { %4850 = vmatmul.mubr.msk.f32.vlgmr.msra.gmra.mrb[10].mxu1 %vm2189_vm7, %v1711_v63  ;;  %v4652_v63 = vcombine.high %v2759_v11, %v2767_v12 }
 0x5ac   : > { %4863 = vmatprep.mubr.msk.f32.mxu1 %vm5073_vm8, %v5074_v42 }
 0x5af   : > { %4857 = vmatmul.mubr.msk.f32.vlgmr.msra.gmra.mrb[12].mxu0 %vm2189_vm7, %v1716_v16  ;;  %v4651_v16 = vcombine.low %v2759_v11, %v2767_v12  ;;  %v2766_v11 = vld [vmem:[%s5968_s4 + $0x38] sm:$0xff] }
 0x5b0   : > { %4870 = vmatprep.mubr.msk.bf16.mxu0 %vm5073_vm8, %v5074_v42  ;;  %4867 = vmatpush3.bf16.msra.mxu0 %v4983_v24  ;;  %v2774_v12 = vld [vmem:[%s5968_s4 + $0x78] sm:$0xff] }
 0x5b1   : > { %4868 = vmatprep.subr.bf16.mxu0 %v5074_v42 }
 0x5b4   : > { %4869 = vmatpush3.bf16.msra.mxu0 %v4984_v25 }
 0x5b5   : > { %3082 = vmatprep.subr.bf16.mxu0 %v4654_v18  ;;  %v2782_v18 = vld [vmem:[%s5968_s4 + $0xb8] sm:$0xff] }
 0x5cd   : > { %v2258_v17 = vpop.xlane.xlu1 %2257 }
 0x5ce   : > { %5015 = vrcp.f32 %v2258_v17  ;;  %v4653_v17 = vcombine.low %v2760_v13, %v2768_v15  ;;  %v4666_v15 = vcombine.high %v2766_v11, %v2774_v12 }
 0x5d1   : > { %v1587_v62 = vpop.permute.xlu1 %1586 }
 0x5d2   : > { %v1719_v23 = vadd.f32 %v5496_v43, %v1587_v62  ;;  %v2784_v62 = vld [vmem:[%s5968_s4 + $0xc8] sm:$0xff] }
 0x5d8   : > { %v5016_v19 = vpop.eup %5015 }
 0x5d9   : > { %v2275_v21 = vmul.f32 %v5016_v19, %v5000_v48  ;;  %v2775_v19 = vld [vmem:[%s5968_s4 + $0x80] sm:$0xff] }
 0x5db   : > { %v4913_v22 = vpack.c.bf16 %v2277_v20, %v2275_v21  ;;  %v2783_v20 = vld [vmem:[%s5968_s4 + $0xc0] sm:$0xff]  ;;  %v2776_v21 = vld [vmem:[%s5968_s4 + $0x88] sm:$0xff] }
 0x5dc   : > { %v4669_v24 = vcombine.low %v2776_v21, %v2784_v62  ;;  %v4670_v25 = vcombine.high %v2776_v21, %v2784_v62  ;;  %v4665_v21 = vcombine.low %v2766_v11, %v2774_v12 }
 0x5dd   : > { %4915 = vmatpush3.bf16.xpose.msk.msra.mxu1 %vm5503_vm9, %v4913_v22  ;;  %v4668_v22 = vcombine.high %v2775_v19, %v2783_v20 }
 0x5de   : > { %3039 = vmatprep.subr.bf16.mxu1 %v4652_v63 }
 0x5e4   : > { %4864 = vmatmul.mubr.msk.f32.vlgmr.msra.gmra.mrb[12].mxu1 %vm2189_vm7, %v1719_v23  ;;  %v4667_v23 = vcombine.low %v2775_v19, %v2783_v20  ;;  %v2790_v19 = vld [vmem:[%s5968_s4 + $0xf8] sm:$0xff] }
 0x5e5   : > { %3071 = vmatprep.mubr.bf16.mxu1 %v5070_v37  ;;  %3040 = vmatpush1.bf16.msra.mxu1 %v4651_v16  ;;  %v2781_v16 = vld [vmem:[%s5968_s4 + $0xb0] sm:$0xff]  ;;  %v4682_v62 = vcombine.high %v2782_v18, %v2790_v19 }
 0x5e6   : > { %3041 = vmatprep.subr.bf16.mxu1 %v4668_v22 }
 0x5e9   : > { %3042 = vmatpush1.bf16.msra.mxu1 %v4667_v23  ;;  %v3431_v23 = vld [vmem:[%s5973_s28] sm:$0xff] }
 0x676   : > { %v2353_v26 = vpop.f32.mrb[8].mxu1 }
 0x677   : > { %v4844_v27 = vpop.f32.mrb[9].mxu1 }
 0x678   : > { %v2769_v27 = vld [vmem:[%s5968_s4 + $0x50] sm:$0xff] }
 0x67e   : > { %v2432_v28 = vpop.f32.mrb[10].mxu1 }
 0x67f   : > { %v2598_v30 = vpack.c.bf16 %v2432_v28, %v2353_v26  ;;  %v4851_v31 = vpop.f32.mrb[11].mxu1  ;;  %v2761_v26 = vld [vmem:[%s5968_s4 + $0x10] sm:$0xff]  ;;  %v2762_v28 = vld [vmem:[%s5968_s4 + $0x18] sm:$0xff] }
 0x680   : > { %v2770_v31 = vld [vmem:[%s5968_s4 + $0x58] sm:$0xff] }
 0x681   : > { %2607 = vxpose.xlu0.c.b16.start [1/2] (short) (narrow) %v2598_v30, 16  ;;  %v4656_v30 = vcombine.high %v2761_v26, %v2769_v27 }
 0x682   : > { %v2511_v32 = vpop.f32.mrb[12].mxu0 }
 0x683   : > { %v4858_v35 = vpop.f32.mrb[13].mxu0  ;;  %3125 = vmatprep.subr.bf16.mxu1 %v4656_v30 }
 0x684   : > { %v4657_v35 = vcombine.low %v2762_v28, %v2770_v31 }
 0x6b7   : > { %v2590_v36 = vpop.f32.mrb[12].mxu1 }
 0x6b8   : > { %v2599_v38 = vpack.c.bf16 %v2590_v36, %v2511_v32  ;;  %v4865_v39 = vpop.f32.mrb[13].mxu1  ;;  %v4655_v32 = vcombine.low %v2761_v26, %v2769_v27  ;;  %v4658_v36 = vcombine.high %v2762_v28, %v2770_v31  ;;  %v3440_v26 = vld [vmem:[%s5973_s28 + $0x48] sm:$0xff]  ;;  %v4681_v28 = vcombine.low %v2782_v18, %v2790_v19 }
 0x6ba   : > { %2608 = vxpose.xlu0.c.b16.end [2/2] (short) (narrow) %v2599_v38, 16  ;;  %v4649_v38 = vld [vmem:[%s5970_s7] ss:$0 sm:$0xff] }
 0x71c   : > { %v2615_v40 = vpop.trf.xlu0 }
 0x71d   : > { %4871 = vmatmul.mubr.msk.bf16.vlgmr.msra.gmra.mrb[16].mxu0 %vm1619_vm3, %v2615_v40 }
 0x71e   : > { %3114 = vmatprep.mubr.bf16.mxu0 %v5070_v37  ;;  %3083 = vmatpush1.bf16.msra.mxu0 %v4653_v17  ;;  %v2789_v17 = vld [vmem:[%s5968_s4 + $0xf0] sm:$0xff] }
 0x71f   : > { %3084 = vmatprep.subr.bf16.mxu0 %v4670_v25  ;;  %v4680_v22 = vcombine.high %v2781_v16, %v2789_v17  ;;  %v3432_v25 = vld [vmem:[%s5973_s28 + $0x8] sm:$0xff]  ;;  %v4679_v27 = vcombine.low %v2781_v16, %v2789_v17 }
 0x720   : > { %v4695_v31 = vcombine.high %v3432_v25, %v3440_v26 }
 0x722   : > { %3085 = vmatpush1.bf16.msra.mxu0 %v4669_v24  ;;  %v3439_v24 = vld [vmem:[%s5973_s28 + $0x40] sm:$0xff] }
 0x723   : > { %3168 = vmatprep.subr.bf16.mxu0 %v4658_v36  ;;  %v4693_v30 = vcombine.high %v3431_v23, %v3439_v24  ;;  %v3447_v36 = vld [vmem:[%s5973_s28 + $0x80] sm:$0xff] }
 0x7f0   : > { %v2672_v42 = vpop.f32.mrb[16].mxu0 }
 0x7f1   : > { %v2673_v43 = vadd.f32 %v4643_v41, %v2672_v42  ;;  %v4872_v44 = vpop.f32.mrb[17].mxu0 }
 0x7f2   : > { %v2675_v45 = vpop.f32.mrb[18].mxu0  ;;  %v4650_v44 = vld [vmem:[%s5972_s19] ss:$0 sm:$0xff] }
 0x7f3   : > { %v2676_v46 = vadd.f32 %v4643_v41, %v2675_v45  ;;  %v4873_v47 = vpop.f32.mrb[19].mxu0  ;;  %v2679_v48 = vadd.f32 %v2673_v43, %v5407_v33 }
 0x7f4   : > { %v2785_v47 = vld [vmem:[%s5968_s4 + $0xd0] sm:$0xff] }
 0x7f5   : > { %v2683_v49 = vsel %vm1619_vm3, %v2679_v48, 0.0  ;;  %v2680_v50 = vadd.f32 %v2676_v46, %v5409_v34  ;;  %v5560_v34 = vld [vmem:[%s5967_s2] ss:$0 sm:$0xff]  ;;  %v2777_v46 = vld [vmem:[%s5968_s4 + $0x90] sm:$0xff] }
 0x7f6   : > { %2684 = vadd.xlane.f32.xlu1 %v2683_v49  ;;  %v2786_v49 = vld [vmem:[%s5968_s4 + $0xd8] sm:$0xff] }
 0x7f7   : > { %v2686_v51 = vsel %vm1619_vm3, %v2680_v50, 0.0 }
 0x7f8   : > { %2687 = vadd.xlane.f32.xlu0 %v2686_v51 }
 0x883   : > { %v2685_v53 = vpop.xlane.xlu1 %2684 }
 0x884   : > { %v2695_v54 = vmul.f32 %v5551_v52, %v2685_v53 }
 0x885   : > { %v2688_v55 = vpop.xlane.xlu0 %2687 }
 0x886   : > { %v2696_v33 = vmul.f32 %v5551_v52, %v2688_v55  ;;  %2699 = vperm.xlu1 %4976, %v2695_v54   ;;  %v4672_v54 = vcombine.high %v2777_v46, %v2785_v47 }
 0x888   : > { %2704 = vperm.xlu0 %4975, %v2696_v33   ;;  %v2763_v33 = vld [vmem:[%s5968_s4 + $0x20] sm:$0xff] }
 0x905   : > { %v2700_v56 = vpop.permute.xlu1 %2699 }
 0x906   : > { %v2707_v57 = vsub.f32 %v2679_v48, %v2700_v56  ;;  %v2778_v48 = vld [vmem:[%s5968_s4 + $0x98] sm:$0xff]  ;;  %v2771_v56 = vld [vmem:[%s5968_s4 + $0x60] sm:$0xff] }
 0x907   : > { %v2705_v58 = vpop.permute.xlu0 %2704  ;;  %v4674_v55 = vcombine.high %v2778_v48, %v2786_v49 }
 0x908   : > { %v2715_v59 = vmul.f32 %v5560_v34, %v2707_v57  ;;  %v2708_v60 = vsub.f32 %v2680_v50, %v2705_v58  ;;  %v2764_v57 = vld [vmem:[%s5968_s4 + $0x28] sm:$0xff] }
 0x909   : > { %v2772_v58 = vld [vmem:[%s5968_s4 + $0x68] sm:$0xff] }
 0x90a   : > { %v2716_v61 = vmul.f32 %v5560_v34, %v2708_v60  ;;  %v2717_v0 = vmul.f32 %v2715_v59, %v2715_v59  ;;  %v4673_v60 = vcombine.low %v2778_v48, %v2786_v49  ;;  %v5660_v48 = vld [vmem:[%s5973_s28 + $0x58] sm:$0xff] }
 0x90c   : > { %v2719_v1 = vsel %vm1619_vm3, %v2717_v0, 0.0  ;;  %v2718_v2 = vmul.f32 %v2716_v61, %v2716_v61  ;;  %v4662_v0 = vcombine.high %v2764_v57, %v2772_v58 }
 0x90d   : > { %2720 = vadd.xlane.f32.xlu1 %v2719_v1  ;;  %v2779_v1 = vld [vmem:[%s5968_s4 + $0xa0] sm:$0xff] }
 0x90e   : > { %v2722_v3 = vsel %vm1619_vm3, %v2718_v2, 0.0  ;;  %v2787_v2 = vld [vmem:[%s5968_s4 + $0xe0] sm:$0xff] }
 0x90f   : > { %2723 = vadd.xlane.f32.xlu0 %v2722_v3  ;;  %v2780_v3 = vld [vmem:[%s5968_s4 + $0xa8] sm:$0xff]  ;;  %v4675_v13 = vcombine.low %v2779_v1, %v2787_v2 }
 0x99a   : > { %v2721_v4 = vpop.xlane.xlu1 %2720 }
 0x99b   : > { %v2725_v5 = vmul.f32 %v5551_v52, %v2721_v4  ;;  %v2788_v4 = vld [vmem:[%s5968_s4 + $0xe8] sm:$0xff] }
 0x99c   : > { %v2724_v6 = vpop.xlane.xlu0 %2723 }
 0x99d   : > { %v2727_v7 = vadd.f32 1e-05, %v2725_v5  ;;  %v2726_v8 = vmul.f32 %v5551_v52, %v2724_v6  ;;  %v4659_v5 = vcombine.low %v2763_v33, %v2771_v56  ;;  %v4661_v6 = vcombine.low %v2764_v57, %v2772_v58  ;;  %v2792_v58 = vld [vmem:[%s5974_s13] sm:$0xff] }
 0x99f   : > { %5017 = vrsqrt.f32 %v2727_v7  ;;  %v2728_v9 = vadd.f32 1e-05, %v2726_v8  ;;  %v4676_v7 = vcombine.high %v2779_v1, %v2787_v2  ;;  %v4678_v8 = vcombine.high %v2780_v3, %v2788_v4 }
 0x9a1   : > { %5019 = vrsqrt.f32 %v2728_v9  ;;  %v2765_v9 = vld [vmem:[%s5968_s4 + $0x30] sm:$0xff] }
 0x9a9   : > { %v5018_v10 = vpop.eup %5017 }
 0x9aa   : > { %2733 = vperm.xlu1 %4976, %v5018_v10   ;;  %v2773_v10 = vld [vmem:[%s5968_s4 + $0x70] sm:$0xff] }
 0x9ab   : > { %v5020_v14 = vpop.eup %5019  ;;  %v4664_v63 = vcombine.high %v2765_v9, %v2773_v10  ;;  %v4663_v20 = vcombine.low %v2765_v9, %v2773_v10 }
 0x9ac   : > { %2738 = vperm.xlu0 %4975, %v5020_v14   ;;  %v4677_v14 = vcombine.low %v2780_v3, %v2788_v4 }
 0xa29   : > { %v2734_v39 = vpop.permute.xlu1 %2733 }
 0xa2a   : > { %v2741_v40 = vmul.f32 %v2734_v39, %v2715_v59  ;;  %v4671_v59 = vcombine.low %v2777_v46, %v2785_v47  ;;  %v5655_v46 = vld [vmem:[%s5973_s28 + $0x18] sm:$0xff] }
 0xa2b   : > { %v2739_v41 = vpop.permute.xlu0 %2738 }
 0xa2c   : > { %v2749_v42 = vmul.f32 %v4649_v38, %v2741_v40  ;;  %v2742_v43 = vmul.f32 %v2739_v41, %v2716_v61  ;;  %v4660_v61 = vcombine.high %v2763_v33, %v2771_v56  ;;  %v3456_v40 = vld [vmem:[%s5973_s28 + $0xc8] sm:$0xff] }
 0xa2e   : > { %v2750_v45 = vmul.f32 %v4649_v38, %v2742_v43  ;;  %v5594_v50 = vadd.f32 %v4650_v44, %v2749_v42  ;;  %v3448_v38 = vld [vmem:[%s5973_s28 + $0x88] sm:$0xff] }
 0xa2f   : > { %v4710_v42 = vcombine.low %v3448_v38, %v3456_v40  ;;  %v4711_v43 = vcombine.high %v3448_v38, %v3456_v40  ;;  %v5709_v40 = vld [vmem:[%s5973_s28 + $0xd8] sm:$0xff] }
 0xa30   : > { %v5596_v51 = vadd.f32 %v4650_v44, %v2750_v45  ;;  %v5649_v44 = vld [vmem:[%s5973_s28 + $0x10] sm:$0xff] }
 0xa31   : > { %v5652_v45 = vld [vmem:[%s5973_s28 + $0x50] sm:$0xff] }
 0xa32   : > { %v5600_v53 = vpack.c.bf16 %v5596_v51, %v5594_v50  ;;  %v4697_v47 = vcombine.high %v5649_v44, %v5652_v45  ;;  %v4696_v49 = vcombine.low %v5649_v44, %v5652_v45  ;;  %v5736_v44 = vld [vmem:[%s5973_s28 + $0x60] sm:$0xff] }
 0xa34   : > { %4683 = vmatmul.mubr.msk.bf16.vlgmr.msra.gmra.mrb[16].mxu1 %vm1619_vm3, %v5600_v53  ;;  %4684 = vmatmul.mubr.msk.bf16.vlgmr.msra.gmra.mrb[20].mxu0 %vm1619_vm3, %v5600_v53 }
 0xa35   : > { %3126 = vmatpush1.bf16.msra.mxu1 %v4655_v32  ;;  %3169 = vmatpush1.bf16.msra.mxu0 %v4657_v35  ;;  %v4692_v32 = vcombine.low %v3431_v23, %v3439_v24  ;;  %v4694_v35 = vcombine.low %v3432_v25, %v3440_v26  ;;  %v5697_v25 = vld [vmem:[%s5974_s13 + $0x8] sm:$0xff] }
 0xa36   : > { %3127 = vmatprep.subr.bf16.mxu1 %v4672_v54  ;;  %3170 = vmatprep.subr.bf16.mxu0 %v4674_v55  ;;  %v4699_v54 = vcombine.high %v5655_v46, %v5660_v48  ;;  %v2796_v55 = vlaneseq }
 0xa37   : > { %3157 = vmatprep.mubr.bf16.mxu1 %v5070_v37  ;;  %3200 = vmatprep.mubr.bf16.mxu0 %v5070_v37 }
 0xa38   : > { %v5668_v33 = vshrl.u32 %v2796_v55, 7 }
 0xa39   : > { %3128 = vmatpush1.bf16.msra.mxu1 %v4671_v59  ;;  %3171 = vmatpush1.bf16.msra.mxu0 %v4673_v60 }
 0xa3a   : > { %3211 = vmatprep.subr.bf16.mxu1 %v4660_v61  ;;  %3254 = vmatprep.subr.bf16.mxu0 %v4662_v0  ;;  %v5671_v56 = vsub.s32 0, %v5668_v33  ;;  %v2806_v57 = vsub.s32 2, %v5668_v33  ;;  %v2802_v59 = vsub.s32 1, %v5668_v33  ;;  %v2810_v60 = vsub.s32 3, %v5668_v33 }
 0xa3b   : > { %v2814_v3 = vsub.s32 4, %v5668_v33  ;;  %v2822_v4 = vsub.s32 6, %v5668_v33  ;;  %vm4124_vm12 = vcmp.eq.s32.totalorder (!%p4726_p12), %v5457_v29, %v5668_v33 }
 0xa3c   : > { %4685 = vmatmul.mubr.msk.bf16.vlgmr.msra.gmra.mrb[20].mxu1 %vm1619_vm3, %v5600_v53  ;;  %4686 = vmatmul.mubr.msk.bf16.vlgmr.msra.gmra.mrb[24].mxu0 %vm1619_vm3, %v5600_v53  ;;  %v2799_v61 = vrot.slane %v2792_v58, %v5671_v56  ;;  %v2807_v0 = vrot.slane %v2792_v58, %v2806_v57  ;;  %v2803_v1 = vrot.slane %v2792_v58, %v2802_v59 }
 0xa3d   : > { %3212 = vmatpush1.bf16.msra.mxu1 %v4659_v5  ;;  %3255 = vmatpush1.bf16.msra.mxu0 %v4661_v6  ;;  %v2811_v2 = vrot.slane %v2792_v58, %v2810_v60 }
 0xa3e   : > { %3213 = vmatprep.subr.bf16.mxu1 %v4676_v7  ;;  %3256 = vmatprep.subr.bf16.mxu0 %v4678_v8  ;;  %v2818_v7 = vsub.s32 5, %v5668_v33  ;;  %v2826_v8 = vsub.s32 7, %v5668_v33 }
 0xa3f   : > { %3243 = vmatprep.mubr.bf16.mxu1 %v5070_v37  ;;  %3286 = vmatprep.mubr.bf16.mxu0 %v5070_v37 }
 0xa40   : > { %v2819_v23 = vrot.slane %v2792_v58, %v2818_v7  ;;  %v2827_v24 = vrot.slane %v2792_v58, %v2826_v8 }
 0xa41   : > { %3214 = vmatpush1.bf16.msra.mxu1 %v4675_v13  ;;  %3257 = vmatpush1.bf16.msra.mxu0 %v4677_v14 }
 0xa42   : > { %3297 = vmatprep.subr.bf16.mxu1 %v4664_v63  ;;  %3340 = vmatprep.subr.bf16.mxu0 %v4666_v15 }
 0xa44   : > { %4687 = vmatmul.mubr.msk.bf16.vlgmr.msra.gmra.mrb[24].mxu1 %vm1619_vm3, %v5600_v53  ;;  %4688 = vmatmul.mubr.msk.bf16.vlgmr.msra.gmra.mrb[28].mxu0 %vm1619_vm3, %v5600_v53 }
 0xa45   : > { %3298 = vmatpush1.bf16.msra.mxu1 %v4663_v20  ;;  %3341 = vmatpush1.bf16.msra.mxu0 %v4665_v21  ;;  %v2815_v20 = vrot.slane %v2792_v58, %v2814_v3  ;;  %v2823_v21 = vrot.slane %v2792_v58, %v2822_v4  ;;  %v2831_v58 = vrot.slane %v5697_v25, %v5671_v56 }
 0xa46   : > { %3299 = vmatprep.subr.bf16.mxu1 %v4680_v22  ;;  %3342 = vmatprep.subr.bf16.mxu0 %v4682_v62 }
 0xa47   : > { %3329 = vmatprep.mubr.bf16.mxu1 %v5070_v37  ;;  %3372 = vmatprep.mubr.bf16.mxu0 %v5070_v37  ;;  %v3455_v37 = vld [vmem:[%s5973_s28 + $0xc0] sm:$0xff] }
 0xa48   : > { %v4709_v39 = vcombine.high %v3447_v36, %v3455_v37  ;;  %v4708_v41 = vcombine.low %v3447_v36, %v3455_v37 }
 0xa49   : > { %3300 = vmatpush1.bf16.msra.mxu1 %v4679_v27  ;;  %3343 = vmatpush1.bf16.msra.mxu0 %v4681_v28 }
 0xa4a   : > { %3630 = vmatprep.subr.bf16.mxu1 %v4693_v30  ;;  %3671 = vmatprep.subr.bf16.mxu0 %v4695_v31  ;;  %v5700_v31 = vld [vmem:[%s5973_s28 + $0x90] sm:$0xff] }
 0xa4c   : > { %4689 = vmatmul.mubr.msk.bf16.vlgmr.msra.gmra.mrb[28].mxu1 %vm1619_vm3, %v5600_v53  ;;  %4690 = vmatmul.mubr.msk.bf16.vlgmr.msra.gmra.mrb[32].mxu0 %vm1619_vm3, %v5600_v53  ;;  %v4698_v53 = vcombine.low %v5655_v46, %v5660_v48  ;;  %v5739_v48 = vld [vmem:[%s5973_s28 + $0x28] sm:$0xff] }
 0xa52   : > { %3631 = vmatpush1.bf16.xpose.msra.mxu1 %v4692_v32  ;;  %3672 = vmatpush1.bf16.xpose.msra.mxu0 %v4694_v35  ;;  %v5703_v32 = vld [vmem:[%s5973_s28 + $0xd0] sm:$0xff] }
 0xa53   : > { %3632 = vmatprep.subr.bf16.mxu1 %v4709_v39  ;;  %3673 = vmatprep.subr.bf16.mxu0 %v4711_v43  ;;  %v5706_v39 = vld [vmem:[%s5973_s28 + $0x98] sm:$0xff] }
 0xa5a   : > { %3633 = vmatpush1.bf16.xpose.msra.mxu1 %v4708_v41  ;;  %3674 = vmatpush1.bf16.xpose.msra.mxu0 %v4710_v42 }
 0xa5b   : > { %3712 = vmatprep.subr.bf16.mxu1 %v4697_v47  ;;  %3753 = vmatprep.subr.bf16.mxu0 %v4699_v54 }
 0xb07   : > { %v3073_v5 = vpop.f32.mrb[16].mxu1  ;;  %v3116_v6 = vpop.f32.mrb[20].mxu0 }
 0xb08   : > { %v3074_v9 = vadd.f32 %v3073_v5, %v2799_v61  ;;  %v3117_v10 = vadd.f32 %v3116_v6, %v2807_v0  ;;  %v3075_v11 = vpop.f32.mrb[17].mxu1  ;;  %v3118_v12 = vpop.f32.mrb[21].mxu0  ;;  %v4713_v5 = vcombine.high %v5700_v31, %v5703_v32  ;;  %v4715_v6 = vcombine.high %v5706_v39, %v5709_v40 }
 0xb09   : > { %v3076_v13 = vadd.f32 %v3075_v11, %v2803_v1  ;;  %v3119_v14 = vadd.f32 %v3118_v12, %v2811_v2  ;;  %v3077_v63 = vpop.f32.mrb[18].mxu1  ;;  %v3120_v15 = vpop.f32.mrb[22].mxu0 }
 0xb0a   : > { %v3078_v16 = vadd.f32 %v3077_v63, %v2799_v61  ;;  %v3121_v17 = vadd.f32 %v3120_v15, %v2807_v0  ;;  %v3079_v18 = vpop.f32.mrb[19].mxu1  ;;  %v3122_v19 = vpop.f32.mrb[23].mxu0  ;;  %v3383_v26 = vmax.f32 %v3074_v9, 0.0  ;;  %v3385_v27 = vmax.f32 %v3117_v10, 0.0 }
 0xb0b   : > { %v3080_v22 = vadd.f32 %v3079_v18, %v2803_v1  ;;  %v3123_v62 = vadd.f32 %v3122_v19, %v2811_v2  ;;  %v3384_v35 = vmax.f32 %v3076_v13, 0.0  ;;  %v3386_v36 = vmax.f32 %v3119_v14, 0.0 }
 0xb0c   : > { %v3399_v28 = vmax.f32 %v3078_v16, 0.0  ;;  %v3401_v30 = vmax.f32 %v3121_v17, 0.0  ;;  %v2839_v13 = vrot.slane %v5697_v25, %v2806_v57  ;;  %v2835_v17 = vrot.slane %v5697_v25, %v2802_v59 }
 0xb0d   : > { %v3400_v37 = vmax.f32 %v3080_v22, 0.0  ;;  %v3402_v38 = vmax.f32 %v3123_v62, 0.0  ;;  %v2843_v57 = vrot.slane %v5697_v25, %v2810_v60  ;;  %v5733_v62 = vld [vmem:[%s5973_s28 + $0x20] sm:$0xff] }
 0xb0e   : > { %v3415_v41 = vpack.c.bf16 %v3399_v28, %v3383_v26  ;;  %v3417_v42 = vpack.c.bf16 %v3401_v30, %v3385_v27 }
 0xb0f   : > { %v3416_v43 = vpack.c.bf16 %v3400_v37, %v3384_v35  ;;  %v3418_v47 = vpack.c.bf16 %v3402_v38, %v3386_v36  ;;  %v3159_v54 = vpop.f32.mrb[20].mxu1  ;;  %v3202_v55 = vpop.f32.mrb[24].mxu0  ;;  %v4712_v35 = vcombine.low %v5700_v31, %v5703_v32  ;;  %v4714_v36 = vcombine.low %v5706_v39, %v5709_v40 }
 0xb10   : > { %v3160_v61 = vadd.f32 %v3159_v54, %v2815_v20  ;;  %v3203_v0 = vadd.f32 %v3202_v55, %v2823_v21  ;;  %v3161_v1 = vpop.f32.mrb[21].mxu1  ;;  %v3204_v2 = vpop.f32.mrb[25].mxu0  ;;  %v2847_v31 = vrot.slane %v5697_v25, %v2814_v3  ;;  %v2859_v3 = vrot.slane %v5697_v25, %v2826_v8 }
 0xb11   : > { %v3162_v9 = vadd.f32 %v3161_v1, %v2819_v23  ;;  %v3205_v10 = vadd.f32 %v3204_v2, %v2827_v24  ;;  %v3163_v11 = vpop.f32.mrb[22].mxu1  ;;  %v3206_v12 = vpop.f32.mrb[26].mxu0  ;;  %3662 = vmatprep.mubr.bf16.mxu1 %v3416_v43  ;;  %3703 = vmatprep.mubr.bf16.mxu0 %v3418_v47  ;;  %v4701_v43 = vcombine.high %v5733_v62, %v5736_v44 }
 0xb12   : > { %v3164_v14 = vadd.f32 %v3163_v11, %v2815_v20  ;;  %v3207_v63 = vadd.f32 %v3206_v12, %v2823_v21  ;;  %v3165_v15 = vpop.f32.mrb[23].mxu1  ;;  %v3208_v16 = vpop.f32.mrb[27].mxu0  ;;  %3663 = vmatmul.mubr.bf16.vlgmr.msra.gmra.mrb[32].mxu1 %v3415_v41  ;;  %3704 = vmatmul.mubr.bf16.vlgmr.msra.gmra.mrb[36].mxu0 %v3417_v42  ;;  %v3387_v20 = vmax.f32 %v3160_v61, 0.0  ;;  %v3389_v21 = vmax.f32 %v3203_v0, 0.0 }
 0xb13   : > { %v3166_v18 = vadd.f32 %v3165_v15, %v2819_v23  ;;  %v3209_v19 = vadd.f32 %v3208_v16, %v2827_v24  ;;  %3713 = vmatpush1.bf16.xpose.msra.mxu1 %v4696_v49  ;;  %3754 = vmatpush1.bf16.xpose.msra.mxu0 %v4698_v53  ;;  %v3388_v45 = vmax.f32 %v3162_v9, 0.0  ;;  %v3390_v49 = vmax.f32 %v3205_v10, 0.0  ;;  %v5742_v53 = vld [vmem:[%s5973_s28 + $0x68] sm:$0xff] }
 0xb14   : > { %v3403_v22 = vmax.f32 %v3164_v14, 0.0  ;;  %v3405_v59 = vmax.f32 %v3207_v63, 0.0  ;;  %3714 = vmatprep.subr.bf16.mxu1 %v4713_v5  ;;  %3755 = vmatprep.subr.bf16.mxu0 %v4715_v6  ;;  %v4703_v47 = vcombine.high %v5739_v48, %v5742_v53  ;;  %v2855_v2 = vrot.slane %v5697_v25, %v2822_v4  ;;  %v3451_v63 = vld [vmem:[%s5973_s28 + $0xa0] sm:$0xff] }
 0xb15   : > { %v3404_v23 = vmax.f32 %v3166_v18, 0.0  ;;  %v3406_v46 = vmax.f32 %v3209_v19, 0.0  ;;  %v2851_v5 = vrot.slane %v5697_v25, %v2818_v7  ;;  %v3452_v18 = vld [vmem:[%s5973_s28 + $0xa8] sm:$0xff] }
 0xb16   : > { %v5744_v24 = vpack.c.bf16 %v3403_v22, %v3387_v20  ;;  %v5746_v60 = vpack.c.bf16 %v3405_v59, %v3389_v21  ;;  %v3460_v19 = vld [vmem:[%s5973_s28 + $0xe8] sm:$0xff]  ;;  %v4700_v21 = vcombine.low %v5733_v62, %v5736_v44 }
 0xb17   : > { %v3420_v26 = vpack.c.bf16 %v3404_v23, %v3388_v45  ;;  %v3422_v27 = vpack.c.bf16 %v3406_v46, %v3390_v49  ;;  %v3245_v28 = vpop.f32.mrb[24].mxu1  ;;  %v3288_v30 = vpop.f32.mrb[28].mxu0  ;;  %v4702_v23 = vcombine.low %v5739_v48, %v5742_v53 }
 0xb18   : > { %v3246_v37 = vadd.f32 %v3245_v28, %v2831_v58  ;;  %v3289_v38 = vadd.f32 %v3288_v30, %v2839_v13  ;;  %v3247_v41 = vpop.f32.mrb[25].mxu1  ;;  %v3290_v42 = vpop.f32.mrb[29].mxu0 }
 0xb19   : > { %v3248_v54 = vadd.f32 %v3247_v41, %v2835_v17  ;;  %v3291_v55 = vadd.f32 %v3290_v42, %v2843_v57  ;;  %v3249_v61 = vpop.f32.mrb[26].mxu1  ;;  %v3292_v0 = vpop.f32.mrb[30].mxu0  ;;  %3744 = vmatprep.mubr.bf16.mxu1 %v3420_v26  ;;  %3785 = vmatprep.mubr.bf16.mxu0 %v3422_v27 }
 0xb1a   : > { %v3250_v32 = vadd.f32 %v3249_v61, %v2831_v58  ;;  %v3293_v39 = vadd.f32 %v3292_v0, %v2839_v13  ;;  %v3251_v40 = vpop.f32.mrb[27].mxu1  ;;  %v3294_v1 = vpop.f32.mrb[31].mxu0  ;;  %v3391_v58 = vmax.f32 %v3246_v37, 0.0  ;;  %v3393_v10 = vmax.f32 %v3289_v38, 0.0  ;;  %v3445_v61 = vld [vmem:[%s5973_s28 + $0x70] sm:$0xff] }
 0xb1b   : > { %v3252_v6 = vadd.f32 %v3251_v40, %v2835_v17  ;;  %v3295_v9 = vadd.f32 %v3294_v1, %v2843_v57  ;;  %3715 = vmatpush1.bf16.xpose.msra.mxu1 %v4712_v35  ;;  %3756 = vmatpush1.bf16.xpose.msra.mxu0 %v4714_v36  ;;  %v3392_v12 = vmax.f32 %v3248_v54, 0.0  ;;  %v3394_v7 = vmax.f32 %v3291_v55, 0.0  ;;  %v3459_v17 = vld [vmem:[%s5973_s28 + $0xe0] sm:$0xff]  ;;  %v3437_v55 = vld [vmem:[%s5973_s28 + $0x30] sm:$0xff] }
 0xb1c   : > { %v3407_v11 = vmax.f32 %v3250_v32, 0.0  ;;  %v3409_v4 = vmax.f32 %v3293_v39, 0.0  ;;  %3794 = vmatprep.subr.bf16.mxu1 %v4701_v43  ;;  %3835 = vmatprep.subr.bf16.mxu0 %v4703_v47  ;;  %v4717_v30 = vcombine.high %v3451_v63, %v3459_v17  ;;  %v4719_v35 = vcombine.high %v3452_v18, %v3460_v19  ;;  %v3438_v32 = vld [vmem:[%s5973_s28 + $0x38] sm:$0xff] }
 0xb1d   : > { %v3408_v13 = vmax.f32 %v3252_v6, 0.0  ;;  %v3410_v14 = vmax.f32 %v3295_v9, 0.0  ;;  %v3446_v39 = vld [vmem:[%s5973_s28 + $0x78] sm:$0xff]  ;;  %v4705_v6 = vcombine.high %v3437_v55, %v3445_v61 }
 0xb1e   : > { %v5769_v15 = vpack.c.bf16 %v3407_v11, %v3391_v58  ;;  %v5771_v16 = vpack.c.bf16 %v3409_v4, %v3393_v10  ;;  %v4707_v9 = vcombine.high %v3438_v32, %v3446_v39  ;;  %v3461_v58 = vld [vmem:[%s5973_s28 + $0xf0] sm:$0xff]  ;;  %v4704_v10 = vcombine.low %v3437_v55, %v3445_v61  ;;  %v3454_v11 = vld [vmem:[%s5973_s28 + $0xb8] sm:$0xff] }
 0xb1f   : > { %v3424_v8 = vpack.c.bf16 %v3408_v13, %v3392_v12  ;;  %v3426_v25 = vpack.c.bf16 %v3410_v14, %v3394_v7  ;;  %v3331_v57 = vpop.f32.mrb[28].mxu1  ;;  %v3374_v20 = vpop.f32.mrb[32].mxu0  ;;  %v3462_v4 = vld [vmem:[%s5973_s28 + $0xf8] sm:$0xff]  ;;  %v4706_v12 = vcombine.low %v3438_v32, %v3446_v39 }
 0xb20   : > { %v3332_v22 = vadd.f32 %v3331_v57, %v2847_v31  ;;  %v3375_v59 = vadd.f32 %v3374_v20, %v2855_v2  ;;  %v3333_v45 = vpop.f32.mrb[29].mxu1  ;;  %v3376_v49 = vpop.f32.mrb[33].mxu0  ;;  %v4723_v13 = vcombine.high %v3454_v11, %v3462_v4 }
 0xb21   : > { %v3334_v46 = vadd.f32 %v3333_v45, %v2851_v5  ;;  %v3377_v26 = vadd.f32 %v3376_v49, %v2859_v3  ;;  %v3335_v27 = vpop.f32.mrb[30].mxu1  ;;  %v3378_v28 = vpop.f32.mrb[34].mxu0 }
 0xb22   : > { %v3336_v36 = vadd.f32 %v3335_v27, %v2847_v31  ;;  %v3379_v37 = vadd.f32 %v3378_v28, %v2855_v2  ;;  %3745 = vmatmul.mubr.bf16.vlgmr.msra.gmra.mrb[36].mxu1 %v5744_v24  ;;  %3786 = vmatmul.mubr.bf16.vlgmr.msra.gmra.mrb[40].mxu0 %v5746_v60  ;;  %v3337_v62 = vpop.f32.mrb[31].mxu1  ;;  %v3380_v44 = vpop.f32.mrb[35].mxu0  ;;  %v3395_v48 = vmax.f32 %v3332_v22, 0.0  ;;  %v3397_v53 = vmax.f32 %v3375_v59, 0.0 }
 0xb23   : > { %v3338_v38 = vadd.f32 %v3337_v62, %v2851_v5  ;;  %v3381_v41 = vadd.f32 %v3380_v44, %v2859_v3  ;;  %3795 = vmatpush1.bf16.xpose.msra.mxu1 %v4700_v21  ;;  %3826 = vmatprep.mubr.bf16.mxu1 %v3424_v8  ;;  %v3396_v47 = vmax.f32 %v3334_v46, 0.0  ;;  %v3398_v24 = vmax.f32 %v3377_v26, 0.0  ;;  %v3453_v3 = vld [vmem:[%s5973_s28 + $0xb0] sm:$0xff] }
 0xb24   : > { %v3411_v42 = vmax.f32 %v3336_v36, 0.0  ;;  %v3413_v43 = vmax.f32 %v3379_v37, 0.0  ;;  %3836 = vmatpush1.bf16.xpose.msra.mxu0 %v4702_v23  ;;  %3867 = vmatprep.mubr.bf16.mxu0 %v3426_v25  ;;  %v4716_v2 = vcombine.low %v3451_v63, %v3459_v17  ;;  %v4718_v5 = vcombine.low %v3452_v18, %v3460_v19 }
 0xb25   : > { %v3412_v54 = vmax.f32 %v3338_v38, 0.0  ;;  %v3414_v60 = vmax.f32 %v3381_v41, 0.0  ;;  %3796 = vmatprep.subr.bf16.mxu1 %v4717_v30  ;;  %3837 = vmatprep.subr.bf16.mxu0 %v4719_v35  ;;  %v4721_v7 = vcombine.high %v3453_v3, %v3461_v58  ;;  %v4720_v14 = vcombine.low %v3453_v3, %v3461_v58 }
 0xb26   : > { %v3427_v0 = vpack.c.bf16 %v3411_v42, %v3395_v48  ;;  %v3429_v31 = vpack.c.bf16 %v3413_v43, %v3397_v53  ;;  %v4722_v63 = vcombine.low %v3454_v11, %v3462_v4 }
 0xb27   : > { %v3428_v40 = vpack.c.bf16 %v3412_v54, %v3396_v47  ;;  %v3430_v1 = vpack.c.bf16 %v3414_v60, %v3398_v24 }
 0xb2b   : > { %3797 = vmatpush1.bf16.xpose.msra.mxu1 %v4716_v2 }
 0xb2c   : > { %3838 = vmatpush1.bf16.xpose.msra.mxu0 %v4718_v5  ;;  %3876 = vmatprep.subr.bf16.mxu1 %v4705_v6 }
 0xb2d   : > { %3917 = vmatprep.subr.bf16.mxu0 %v4707_v9 }
 0xb32   : > { %3827 = vmatmul.mubr.bf16.vlgmr.msra.gmra.mrb[40].mxu1 %v5769_v15  ;;  %v4691_v15 = vld [vmem:[%s1243_s0] ss:$0 sm:$0xff] }
 0xb33   : > { %3868 = vmatmul.mubr.bf16.vlgmr.msra.gmra.mrb[44].mxu0 %v5771_v16  ;;  %3877 = vmatpush1.bf16.xpose.msra.mxu1 %v4704_v10 }
 0xb34   : > { %3908 = vmatprep.mubr.bf16.mxu1 %v3428_v40  ;;  %3918 = vmatpush1.bf16.xpose.msra.mxu0 %v4706_v12 }
 0xb35   : > { %3949 = vmatprep.mubr.bf16.mxu0 %v3430_v1  ;;  %3878 = vmatprep.subr.bf16.mxu1 %v4721_v7 }
 0xb36   : > { %3919 = vmatprep.subr.bf16.mxu0 %v4723_v13 }
 0xb3b   : > { %3879 = vmatpush1.bf16.xpose.msra.mxu1 %v4720_v14 }
 0xb3c   : > { %3920 = vmatpush1.bf16.xpose.msra.mxu0 %v4722_v63 }
 0xb42   : > { %3909 = vmatmul.mubr.bf16.vlgmr.msra.gmra.mrb[44].mxu1 %v3427_v0 }
 0xb43   : > { %3950 = vmatmul.mubr.bf16.vlgmr.msra.gmra.mrb[48].mxu0 %v3429_v31 }
 0xbe5   : > { %v3664_v17 = vpop.f32.mrb[32].mxu1  ;;  %v3705_v18 = vpop.f32.mrb[36].mxu0 }
 0xbe6   : > { %v3665_v16 = vadd.f32 %v4691_v15, %v3664_v17  ;;  %v3666_v19 = vpop.f32.mrb[33].mxu1  ;;  %v3707_v8 = vpop.f32.mrb[37].mxu0 }
 0xbe7   : > { %v3667_v25 = vpop.f32.mrb[34].mxu1  ;;  %v3708_v57 = vpop.f32.mrb[38].mxu0 }
 0xbe8   : > { %v3706_v20 = vadd.f32 %v3705_v18, %v3665_v16  ;;  %v3668_v21 = vadd.f32 %v4691_v15, %v3667_v25  ;;  %v3669_v22 = vpop.f32.mrb[35].mxu1  ;;  %v3710_v59 = vpop.f32.mrb[39].mxu0 }
 0xbea   : > { %v3709_v45 = vadd.f32 %v3708_v57, %v3668_v21 }
 0xbf5   : > { %v3746_v49 = vpop.f32.mrb[36].mxu1  ;;  %v3787_v23 = vpop.f32.mrb[40].mxu0 }
 0xbf6   : > { %v3747_v46 = vadd.f32 %v3746_v49, %v3706_v20  ;;  %v3748_v26 = vpop.f32.mrb[37].mxu1  ;;  %v3789_v27 = vpop.f32.mrb[41].mxu0 }
 0xbf7   : > { %v3749_v28 = vpop.f32.mrb[38].mxu1  ;;  %v3790_v30 = vpop.f32.mrb[42].mxu0 }
 0xbf8   : > { %v3788_v35 = vadd.f32 %v3787_v23, %v3747_v46  ;;  %v3750_v36 = vadd.f32 %v3749_v28, %v3709_v45  ;;  %v3751_v37 = vpop.f32.mrb[39].mxu1  ;;  %v3792_v62 = vpop.f32.mrb[43].mxu0  ;;  %v4724_v46 = vld [vmem:[%s1250_s12] ss:$0 sm:$0xff] }
 0xbf9   : > { %v4725_v28 = vld [vmem:[%s1257_s25] ss:$0 sm:$0xff] }
 0xbfa   : > { %v3791_v44 = vadd.f32 %v3790_v30, %v3750_v36 }
 0xc05   : > { %v3828_v38 = vpop.f32.mrb[40].mxu1 }
 0xc06   : > { %v3829_v41 = vadd.f32 %v3828_v38, %v3788_v35  ;;  %v3869_v48 = vpop.f32.mrb[44].mxu0  ;;  %v3830_v53 = vpop.f32.mrb[41].mxu1  ;;  %v5075_v38 = vmov (!%p4726_p12), 0.0|0.0  }
 0xc07   : > { %v3871_v42 = vpop.f32.mrb[45].mxu0  ;;  %v3831_v43 = vpop.f32.mrb[42].mxu1  ;;  %4916 = vmatprep.subr.bf16.mxu0 (!%p4726_p12), %v5075_v38  ;;  %v5078_v53 = vmov (!%p4726_p12), 0   ;;  %4920 = vmatprep.subr.bf16.mxu1 (!%p4726_p12), %v5075_v38 }
 0xc08   : > { %v3870_v47 = vadd.f32 %v3869_v48, %v3829_v41  ;;  %v3832_v24 = vadd.f32 %v3831_v43, %v3791_v44  ;;  %v3872_v54 = vpop.f32.mrb[46].mxu0  ;;  %v3833_v60 = vpop.f32.mrb[43].mxu1  ;;  %v5077_v41 = vmov (!%p4726_p12), 0.0   ;;  %v4033_v48 = vld [vmem:[%s1263_s22] sm:$0x1] (!%p4726_p12) }
 0xc09   : > { %v3874_v55 = vpop.f32.mrb[47].mxu0  ;;  %4878 = vmatprep.mubr.msk.f32.mxu0 (!%p4726_p12), %vm5076_vm11, %v5077_v41  ;;  %4885 = vmatprep.mubr.msk.f32.mxu1 (!%p4726_p12), %vm5076_vm11, %v5077_v41  ;;  %v4032_v42 = vld [vmem:[%s1260_s9] sm:$0x1] (!%p4726_p12) }
 0xc0a   : > { %v3873_v61 = vadd.f32 %v3872_v54, %v3832_v24 }
 0xc15   : > { %v3910_v0 = vpop.f32.mrb[44].mxu1 }
 0xc16   : > { %v3911_v31 = vadd.f32 %v3910_v0, %v3870_v47  ;;  %v3951_v32 = vpop.f32.mrb[48].mxu0  ;;  %v3912_v39 = vpop.f32.mrb[45].mxu1 }
 0xc17   : > { %v3953_v40 = vpop.f32.mrb[49].mxu0  ;;  %v3913_v1 = vpop.f32.mrb[46].mxu1 }
 0xc18   : > { %v3952_v2 = vadd.f32 %v3951_v32, %v3911_v31  ;;  %v3914_v5 = vadd.f32 %v3913_v1, %v3873_v61  ;;  %v3954_v6 = vpop.f32.mrb[50].mxu0  ;;  %v3915_v9 = vpop.f32.mrb[47].mxu1 }
 0xc19   : > { %v3956_v3 = vpop.f32.mrb[51].mxu0 }
 0xc1a   : > { %v3955_v58 = vadd.f32 %v3954_v6, %v3914_v5  ;;  %v3958_v10 = vadd.f32 %v3952_v2, %v5594_v50 }
 0xc1c   : > { %v3962_v11 = vsel %vm1619_vm3, %v3958_v10, 0.0  ;;  %v3959_v4 = vadd.f32 %v3955_v58, %v5596_v51 }
 0xc1d   : > { %3963 = vadd.xlane.f32.xlu1 %v3962_v11 }
 0xc1e   : > { %v3965_v12 = vsel %vm1619_vm3, %v3959_v4, 0.0 }
 0xc1f   : > { %3966 = vadd.xlane.f32.xlu0 %v3965_v12 }
 0xcaa   : > { %v3964_v7 = vpop.xlane.xlu1 %3963 }
 0xcab   : > { %v3968_v13 = vmul.f32 %v5551_v52, %v3964_v7 }
 0xcac   : > { %v3967_v14 = vpop.xlane.xlu0 %3966 }
 0xcad   : > { %v3969_v63 = vmul.f32 %v5551_v52, %v3967_v14  ;;  %3972 = vperm.xlu1 %4976, %v3968_v13  }
 0xcaf   : > { %3977 = vperm.xlu0 %4975, %v3969_v63  }
 0xd2c   : > { %v3973_v15 = vpop.permute.xlu1 %3972 }
 0xd2d   : > { %v3980_v17 = vsub.f32 %v3958_v10, %v3973_v15 }
 0xd2e   : > { %v3978_v18 = vpop.permute.xlu0 %3977 }
 0xd2f   : > { %v3982_v50 = vmul.f32 %v5560_v34, %v3980_v17  ;;  %v3981_v16 = vsub.f32 %v3959_v4, %v3978_v18 }
 0xd31   : > { %v3983_v51 = vmul.f32 %v5560_v34, %v3981_v16  ;;  %v3984_v19 = vmul.f32 %v3982_v50, %v3982_v50 }
 0xd33   : > { %v3986_v8 = vsel %vm1619_vm3, %v3984_v19, 0.0  ;;  %v3985_v25 = vmul.f32 %v3983_v51, %v3983_v51 }
 0xd34   : > { %3987 = vadd.xlane.f32.xlu1 %v3986_v8 }
 0xd35   : > { %v3989_v57 = vsel %vm1619_vm3, %v3985_v25, 0.0 }
 0xd36   : > { %3990 = vadd.xlane.f32.xlu0 %v3989_v57 }
 0xdc1   : > { %v3988_v20 = vpop.xlane.xlu1 %3987 }
 0xdc2   : > { %v3992_v21 = vmul.f32 %v5551_v52, %v3988_v20 }
 0xdc3   : > { %v3991_v22 = vpop.xlane.xlu0 %3990 }
 0xdc4   : > { %v3994_v59 = vadd.f32 1e-05, %v3992_v21  ;;  %v3993_v45 = vmul.f32 %v5551_v52, %v3991_v22 }
 0xdc6   : > { %5021 = vrsqrt.f32 %v3994_v59  ;;  %v3995_v49 = vadd.f32 1e-05, %v3993_v45 }
 0xdc8   : > { %5023 = vrsqrt.f32 %v3995_v49 }
 0xdd0   : > { %v5022_v34 = vpop.eup %5021 }
 0xdd1   : > { %4000 = vperm.xlu1 %4976, %v5022_v34  }
 0xdd2   : > { %v5024_v23 = vpop.eup %5023 }
 0xdd3   : > { %4005 = vperm.xlu0 %4975, %v5024_v23  }
 0xdd7   : > { %5025 = vset.pattern.permute.xlu0 (!%p4726_p12), %v5078_v53 }
 0xdd8   : > { %4036 = vperm.xlu0 (!%p4726_p12), %5025, %v4033_v48  }
 0xe50   : > { %v4001_v26 = vpop.permute.xlu1 %4000 }
 0xe51   : > { %v4008_v27 = vmul.f32 %v4001_v26, %v3982_v50 }
 0xe52   : > { %v4006_v52 = vpop.permute.xlu0 %4005 }
 0xe53   : > { %v4016_v30 = vmul.f32 %v4724_v46, %v4008_v27  ;;  %v4009_v35 = vmul.f32 %v4006_v52, %v3983_v51  ;;  %4031 = sbr.rel (%p4726_p12) target bundleno = 4426 (0x114a), region = 132 }
 0xe55   : > { %v4024_v36 = vadd.f32 %v4725_v28, %v4016_v30  ;;  %v4017_v37 = vmul.f32 %v4724_v46, %v4009_v35 }
 0xe57   : > { %4026 = vst.msk [vmem:[#allocation2] sm:$0xff] %vm1619_vm3, %v4024_v36  ;;  %v4025_v62 = vadd.f32 %v4725_v28, %v4017_v37  ;;  %v4037_v43 = vpop.permute.xlu0 (!%p4726_p12), %4036 }
 0xe58   : > { %v4042_v47 = vrot.slane (!%p4726_p12), %v4037_v43, %v5671_v56 }
 0xe59   : > { %4027 = vst.msk [vmem:[#allocation2 + $0x8] sm:$0xff] %vm1619_vm3, %v4025_v62  ;;  %v4917_v44 = vpack.c.bf16 (!%p4726_p12), %v4025_v62, %v4024_v36 }
 0xe5b   : > { %4919 = vmatpush3.bf16.xpose.msk.msra.mxu0 %vm4918_vm10, %v4917_v44  ;;  %4922 = vmatpush3.bf16.msra.mxu1 %v4917_v44 }
 0xe62   : > { %4879 = vmatmul.mubr.msk.f32.vlgmr.msra.gmra.mrb[0].mxu0 %vm1619_vm3, %v4032_v42 }
 0xf35   : > { %v4118_v24 = vpop.f32.mrb[0].mxu0 }
 0xf36   : > { %v4119_v54 = vadd.f32 %v4118_v24, %v4042_v47  ;;  %v4880_v60 = vpop.f32.mrb[1].mxu0 }
 0xf38   : > { %v4128_v55 = vrot.slane %v4119_v54, %v5671_v56 }
 0xf3a   : > { %v4129_v61 = vsel %vm4124_vm12, %v4128_v55, -1e+30 }
 0xf3b   : > { %v4131_v0 = vsel %vm4130_vm13, %v4129_v61, -inf }
 0xf3c   : > { %4132 = vmax.xlane.f32.xlu0 %v4131_v0 }
 0xfc9   : > { %v4133_v31 = vpop.xlane.xlu0 %4132 }
 0xfca   : > { %v4134_v32 = vsub.f32 %v4129_v61, %v4133_v31 }
 0xfcc   : > { %v4135_v39 = vmul.f32 1.442695, %v4134_v32 }
 0xfce   : > { %5026 = vpow2.f32 %v4135_v39 }
 0xfd8   : > { %v5027_v40 = vpop.eup %5026 }
 0xfd9   : > { %v4137_v1 = vsel %vm4130_vm13, %v5027_v40, 0.0 }
 0xfda   : > { %4138 = vadd.xlane.f32.xlu1 %v4137_v1 }
0x1067   : > { %v4139_v2 = vpop.xlane.xlu1 %4138 }
0x1068   : > { %5028 = vrcp.f32 %v4139_v2 }
0x1072   : > { %v5029_v5 = vpop.eup %5028 }
0x1073   : > { %v4141_v6 = vmul.f32 %v5029_v5, %v5027_v40 }
0x1075   : > { %4886 = vmatmul.mubr.msk.f32.vlgmr.msra.gmra.mrb[0].mxu1 %vm2189_vm7, %v4141_v6 }
0x1148   : > { %v4211_v29 = vpop.f32.mrb[0].mxu1 }
0x1149   : > { %4216 = vst.msk [vmem:[%s5362_s18] sm:$0x3] %vm4215_vm14, %v4211_v29  ;;  %v4887_v33 = vpop.f32.mrb[1].mxu1 }
0x114a PF: > { %s5980_s1 = sld [smem:[#allocation5_spill]]  ;;  %s5981_s29 = sld [smem:[#allocation3_spill]] }
0x114b   : > { %s5982_s2 = sld [smem:[#allocation4_spill]]  ;;  %s5983_s6 = sld [smem:[#allocation6_spill]] }
0x114c   : > { %s5984_s30 = sld [smem:[#allocation7_spill]] }
0x1150   : > { %s35_s7 = sadd.s32 1, %s5980_s1  }
0x1151   : > { %p32_p13 = scmp.ge.s32.totalorder %s35_s7, 6  }
0x1153   :  { %34 = sbr.rel (!%p32_p13) target bundleno = 27 (0x1b), region = 222 }

</bundles_post_ra>
